<compile_context>
chip_gen: v7x
topology: tpu7x:2x2x1
jax: 0.10.0
libtpu: 0.0.40
codegen_flags: <defaults>
</compile_context>

<pallas_src>
import functools

import jax
import jax.numpy as jnp
from jax import lax
from jax.experimental import pallas as pl
from jax.experimental.pallas import tpu as pltpu


def _round_up(x, m):
    return ((x + m - 1) // m) * m


def conv_relu_pool_kernel(x_ref, wk_ref, bconv_ref, out_ref, *, k, Ho, Wo):
    """Fused conv (in-kernel im2col) + bias + ReLU + 2x2 maxpool for one image.

    x_ref:     (1, 4, Hh, Wh, CP) f32  even/odd spatial planes of the padded
                                       NHWC image: plane 2*s+t row j, col i
                                       holds x_pad[2j+s, 2i+t, :].
    wk_ref:    (k*k, CP, F) f32        row dy*k+dx holds w_conv[:, :, dy, dx]^T.
    bconv_ref: (1, F) f32
    out_ref:   (1, Ho*Wo, F) bf16      pooled activations, rows (ho, wo)-major.
    """
    Mo = Ho * Wo
    CP = x_ref.shape[-1]
    F = wk_ref.shape[-1]

    # One accumulator over all four 2x2-pool candidate positions: rows
    # [p*Mo, (p+1)*Mo) hold pool position p = 2*py + px.  At this size the
    # (4*Mo, F) f32 value is ~32 KB, so the "tall matmul" form is fine.
    acc = jnp.zeros((4 * Mo, F), jnp.float32)
    for dy in range(k):
        for dx in range(k):
            wins = []
            for py in range(2):
                for px in range(2):
                    a, b = py + dy, px + dx
                    plane = (a % 2) * 2 + (b % 2)
                    # padded-image rows 2*ho + py + dy == rows [a//2, a//2+Ho)
                    # of plane (a%2, b%2); same for columns.
                    win = x_ref[0, plane,
                                a // 2:a // 2 + Ho,
                                b // 2:b // 2 + Wo, :]            # (Ho, Wo, CP)
                    wins.append(win.reshape(Mo, CP))
            lhs = jnp.concatenate(wins, axis=0)                    # (4*Mo, CP)
            acc = acc + jnp.dot(lhs, wk_ref[dy * k + dx],
                                preferred_element_type=jnp.float32)

    cand = acc.reshape(4, Mo, F)
    pooled = jnp.maximum(jnp.maximum(cand[0], cand[1]),
                         jnp.maximum(cand[2], cand[3]))
    # bias + ReLU once, after the pool max (mathematically identical).
    out_ref[0] = jnp.maximum(pooled + bconv_ref[...], 0.0).astype(out_ref.dtype)


def fc_kernel(feat_ref, w_ref, b_ref, out_ref):
    """Affine layer in one step: out = feat @ w + b (no reduction grid, no scratch)."""
    out_ref[...] = (jnp.dot(feat_ref[...], w_ref[...],
                            preferred_element_type=jnp.float32) + b_ref[...])


def prepare_params(w_conv, b_conv, w_fc, b_fc, *, kernel_size, im_size):
    """One-time weight preparation (hoisted out of the jitted forward)."""
    C, H, W = im_size
    k = kernel_size
    F = w_conv.shape[0]
    Ho, Wo = H // 2, W // 2
    CP = _round_up(C, 8)
    n_classes = w_fc.shape[0]
    NCP = _round_up(n_classes, 128)
    D = F * Ho * Wo

    # conv weight (F, C, k, k) -> (k*k, CP, F); zero-padded channels contribute 0.
    wk = jnp.transpose(w_conv, (2, 3, 1, 0))                       # (k, k, C, F)
    wk = jnp.pad(wk, ((0, 0), (0, 0), (0, CP - C), (0, 0)))
    wk = wk.reshape(k * k, CP, F).astype(jnp.float32)
    bconv = b_conv.reshape(1, F).astype(jnp.float32)

    # FC weight: permute PyTorch's (f, ho, wo) flatten order to the kernel's
    # (ho, wo, f) order and pad classes to a full 128-lane group so the score
    # writeback is lane-dense / unmasked.
    w_perm = jnp.transpose(w_fc.reshape(n_classes, F, Ho, Wo), (2, 3, 1, 0))
    w_perm = w_perm.reshape(D, n_classes)
    w_perm = jnp.pad(w_perm, ((0, 0), (0, NCP - n_classes))).astype(jnp.bfloat16)
    b_pad = jnp.pad(b_fc, (0, NCP - n_classes)).reshape(1, NCP).astype(jnp.float32)
    return wk, bconv, w_perm, b_pad


@functools.partial(jax.jit, static_argnames=("kernel_size", "n_classes"))
def cnn_forward(x, wk, bconv, w_fc_perm, b_fc_pad, *, kernel_size, n_classes):
    N, C, H, W = x.shape
    k = kernel_size
    assert k % 2 == 1, "module's 'same' padding assumption requires odd kernel"
    assert H % 2 == 0 and W % 2 == 0, "2x2 maxpool assumes even spatial dims"
    pad = (k - 1) // 2
    kk, CP, F = wk.shape
    Ho, Wo = H // 2, W // 2
    Mo = Ho * Wo
    Hh, Wh = (H + k - 1) // 2, (W + k - 1) // 2
    NCP = b_fc_pad.shape[1]
    D = Mo * F

    # ---- input prep: pad -> NHWC -> even/odd spatial planes (NO expansion) ----
    xp = jnp.pad(x, ((0, 0), (0, 0), (pad, pad), (pad, pad)))
    xp = jnp.transpose(xp, (0, 2, 3, 1))                           # (N, Hp, Wp, C)
    xp = jnp.pad(xp, ((0, 0), (0, 0), (0, 0), (0, CP - C)))
    xp = xp.reshape(N, Hh, 2, Wh, 2, CP)
    x_planes = jnp.transpose(xp, (0, 2, 4, 1, 3, 5)).reshape(N, 4, Hh, Wh, CP)
    x_planes = x_planes.astype(jnp.float32)

    # ---- conv + bias + ReLU + 2x2 maxpool; grid over batch (2 steps -> both
    # ---- v7x TensorCores via "parallel") -------------------------------------
    pooled = pl.pallas_call(
        functools.partial(conv_relu_pool_kernel, k=k, Ho=Ho, Wo=Wo),
        out_shape=jax.ShapeDtypeStruct((N, Mo, F), jnp.bfloat16),
        grid=(N,),
        in_specs=[
            pl.BlockSpec((1, 4, Hh, Wh, CP), lambda n: (n, 0, 0, 0, 0)),
            pl.BlockSpec((kk, CP, F), lambda n: (0, 0, 0)),
            pl.BlockSpec((1, F), lambda n: (0, 0)),
        ],
        out_specs=pl.BlockSpec((1, Mo, F), lambda n: (n, 0, 0)),
        compiler_params=pltpu.CompilerParams(
            dimension_semantics=("parallel",),
            vmem_limit_bytes=32 * 1024 * 1024),
    )(x_planes, wk, bconv)

    # Rows are already (n, ho, wo)-major -> metadata-only reshape, no transpose
    # or extra HBM round trip of the activations.
    feat = pooled.reshape(N, D)

    # ---- affine: one whole-array matmul (everything fits VMEM) ---------------
    scores_pad = pl.pallas_call(
        fc_kernel,
        out_shape=jax.ShapeDtypeStruct((N, NCP), jnp.float32),
        compiler_params=pltpu.CompilerParams(
            vmem_limit_bytes=32 * 1024 * 1024),
    )(feat, w_fc_perm, b_fc_pad)

    return scores_pad[:, :n_classes]


def cnn_reference(x, w_conv, b_conv, w_fc, b_fc, kernel_size):
    """Pure-JAX f32 reference matching the PyTorch forward."""
    pad = (kernel_size - 1) // 2
    out = lax.conv_general_dilated(
        x, w_conv, window_strides=(1, 1), padding=[(pad, pad), (pad, pad)],
        dimension_numbers=("NCHW", "OIHW", "NCHW"))
    out = out + b_conv.reshape(1, -1, 1, 1)
    out = jnp.maximum(out, 0.0)
    out = lax.reduce_window(out, -jnp.inf, lax.max,
                            (1, 1, 2, 2), (1, 1, 2, 2), "VALID")
    N = x.shape[0]
    return out.reshape(N, -1) @ w_fc.T + b_fc


if __name__ == "__main__":
    # Shapes consistent with the module: im_size=(3, 16, 16), hidden_dim=32,
    # kernel_size=3, n_classes=10, batch=2.
    N, C, H, W = 2, 3, 16, 16
    hidden_dim, kernel_size, n_classes = 32, 3, 10

    key = jax.random.PRNGKey(0)
    k1, k2, k3, k4, k5 = jax.random.split(key, 5)
    x = jax.random.normal(k1, (N, C, H, W), jnp.float32)

    fan_in_conv = C * kernel_size * kernel_size
    w_conv = jax.random.normal(
        k2, (hidden_dim, C, kernel_size, kernel_size),
        jnp.float32) / jnp.sqrt(fan_in_conv)
    b_conv = jax.random.normal(k3, (hidden_dim,), jnp.float32) * 0.1

    D = hidden_dim * (H // 2) * (W // 2)
    w_fc = jax.random.normal(k4, (n_classes, D), jnp.float32) / jnp.sqrt(D)
    b_fc = jax.random.normal(k5, (n_classes,), jnp.float32) * 0.1

    # Weight prep hoisted out of the jitted forward (done once, not per call).
    wk, bconv, w_fc_perm, b_fc_pad = prepare_params(
        w_conv, b_conv, w_fc, b_fc, kernel_size=kernel_size, im_size=(C, H, W))

    scores = cnn_forward(x, wk, bconv, w_fc_perm, b_fc_pad,
                         kernel_size=kernel_size, n_classes=n_classes)
    scores = jax.block_until_ready(scores)

    ref = cnn_reference(x, w_conv, b_conv, w_fc, b_fc, kernel_size)
    assert scores.shape == (N, n_classes)
    max_diff = float(jnp.max(jnp.abs(scores - ref)))
    # f32 conv, bf16 FC operands with f32 accumulation -> slightly loose tol.
    assert jnp.allclose(scores, ref, atol=3e-2, rtol=3e-2), (
        "max abs diff = %g" % max_diff)

    print("KERNEL_OK")
</pallas_src>

<mosaic_0001>
module attributes {stable_mosaic.version = 11 : i64} {
  func.func @conv_relu_pool_kernel(%arg0: i32, %arg1: memref<1x4x9x9x8xf32, #tpu.memory_space<vmem>>, %arg2: memref<9x8x32xf32, #tpu.memory_space<vmem>>, %arg3: memref<1x32xf32, #tpu.memory_space<vmem>>, %arg4: memref<1x64x32xbf16, #tpu.memory_space<vmem>>) attributes {dimension_semantics = [#tpu.dimension_semantics<parallel>], iteration_bounds = array<i64: 2>, scalar_prefetch = 0 : i64, scratch_operands = 0 : i64, tpu.core_type = #tpu.core_type<tc>, window_params = [{transform_indices = @transform_0, window_bounds = array<i64: 1, 4, 9, 9, 8>}, {pipeline_mode = #tpu.pipeline_mode<synchronous>, transform_indices = @transform_1, window_bounds = array<i64: 9, 8, 32>}, {pipeline_mode = #tpu.pipeline_mode<synchronous>, transform_indices = @transform_2, window_bounds = array<i64: 1, 32>}, {transform_indices = @transform_3, window_bounds = array<i64: 1, 64, 32>}]} {
    %cst = arith.constant 0.000000e+00 : f32
    %0 = vector.broadcast %cst : f32 to vector<256x32xf32>
    %c0 = arith.constant 0 : index
    %c0_0 = arith.constant 0 : index
    %c0_1 = arith.constant 0 : index
    %c0_2 = arith.constant 0 : index
    %c0_3 = arith.constant 0 : index
    %1 = vector.load %arg1[%c0, %c0_0, %c0_1, %c0_2, %c0_3] : memref<1x4x9x9x8xf32, #tpu.memory_space<vmem>>, vector<1x1x8x8x8xf32>
    %2 = vector.shape_cast %1 : vector<1x1x8x8x8xf32> to vector<8x8x8xf32>
    %3 = vector.shape_cast %2 : vector<8x8x8xf32> to vector<64x8xf32>
    %c0_4 = arith.constant 0 : index
    %c1 = arith.constant 1 : index
    %c0_5 = arith.constant 0 : index
    %c0_6 = arith.constant 0 : index
    %c0_7 = arith.constant 0 : index
    %4 = vector.load %arg1[%c0_4, %c1, %c0_5, %c0_6, %c0_7] : memref<1x4x9x9x8xf32, #tpu.memory_space<vmem>>, vector<1x1x8x8x8xf32>
    %5 = vector.shape_cast %4 : vector<1x1x8x8x8xf32> to vector<8x8x8xf32>
    %6 = vector.shape_cast %5 : vector<8x8x8xf32> to vector<64x8xf32>
    %c0_8 = arith.constant 0 : index
    %c2 = arith.constant 2 : index
    %c0_9 = arith.constant 0 : index
    %c0_10 = arith.constant 0 : index
    %c0_11 = arith.constant 0 : index
    %7 = vector.load %arg1[%c0_8, %c2, %c0_9, %c0_10, %c0_11] : memref<1x4x9x9x8xf32, #tpu.memory_space<vmem>>, vector<1x1x8x8x8xf32>
    %8 = vector.shape_cast %7 : vector<1x1x8x8x8xf32> to vector<8x8x8xf32>
    %9 = vector.shape_cast %8 : vector<8x8x8xf32> to vector<64x8xf32>
    %c0_12 = arith.constant 0 : index
    %c3 = arith.constant 3 : index
    %c0_13 = arith.constant 0 : index
    %c0_14 = arith.constant 0 : index
    %c0_15 = arith.constant 0 : index
    %10 = vector.load %arg1[%c0_12, %c3, %c0_13, %c0_14, %c0_15] : memref<1x4x9x9x8xf32, #tpu.memory_space<vmem>>, vector<1x1x8x8x8xf32>
    %11 = vector.shape_cast %10 : vector<1x1x8x8x8xf32> to vector<8x8x8xf32>
    %12 = vector.shape_cast %11 : vector<8x8x8xf32> to vector<64x8xf32>
    %13 = tpu.concatenate %3, %6, %9, %12 in 0 : vector<64x8xf32>, vector<64x8xf32>, vector<64x8xf32>, vector<64x8xf32> -> vector<256x8xf32>
    %c0_16 = arith.constant 0 : index
    %c0_17 = arith.constant 0 : index
    %c0_18 = arith.constant 0 : index
    %14 = vector.load %arg2[%c0_16, %c0_17, %c0_18] : memref<9x8x32xf32, #tpu.memory_space<vmem>>, vector<1x8x32xf32>
    %15 = vector.shape_cast %14 : vector<1x8x32xf32> to vector<8x32xf32>
    %cst_19 = arith.constant dense<0.000000e+00> : vector<256x32xf32>
    %16 = tpu.matmul %13, %15, %cst_19 {dimension_numbers = #tpu.dot_dimension_numbers<[1], [0], [0], [1], [0, 0, 1, 1], [], []>} : vector<256x8xf32>, vector<8x32xf32>, vector<256x32xf32> -> vector<256x32xf32>
    %17 = arith.addf %0, %16 : vector<256x32xf32>
    %c0_20 = arith.constant 0 : index
    %c1_21 = arith.constant 1 : index
    %c0_22 = arith.constant 0 : index
    %c0_23 = arith.constant 0 : index
    %c0_24 = arith.constant 0 : index
    %18 = vector.load %arg1[%c0_20, %c1_21, %c0_22, %c0_23, %c0_24] : memref<1x4x9x9x8xf32, #tpu.memory_space<vmem>>, vector<1x1x8x8x8xf32>
    %19 = vector.shape_cast %18 : vector<1x1x8x8x8xf32> to vector<8x8x8xf32>
    %20 = vector.shape_cast %19 : vector<8x8x8xf32> to vector<64x8xf32>
    %c0_25 = arith.constant 0 : index
    %c0_26 = arith.constant 0 : index
    %c0_27 = arith.constant 0 : index
    %c1_28 = arith.constant 1 : index
    %c0_29 = arith.constant 0 : index
    %21 = vector.load %arg1[%c0_25, %c0_26, %c0_27, %c1_28, %c0_29] : memref<1x4x9x9x8xf32, #tpu.memory_space<vmem>>, vector<1x1x8x8x8xf32>
    %22 = vector.shape_cast %21 : vector<1x1x8x8x8xf32> to vector<8x8x8xf32>
    %23 = vector.shape_cast %22 : vector<8x8x8xf32> to vector<64x8xf32>
    %c0_30 = arith.constant 0 : index
    %c3_31 = arith.constant 3 : index
    %c0_32 = arith.constant 0 : index
    %c0_33 = arith.constant 0 : index
    %c0_34 = arith.constant 0 : index
    %24 = vector.load %arg1[%c0_30, %c3_31, %c0_32, %c0_33, %c0_34] : memref<1x4x9x9x8xf32, #tpu.memory_space<vmem>>, vector<1x1x8x8x8xf32>
    %25 = vector.shape_cast %24 : vector<1x1x8x8x8xf32> to vector<8x8x8xf32>
    %26 = vector.shape_cast %25 : vector<8x8x8xf32> to vector<64x8xf32>
    %c0_35 = arith.constant 0 : index
    %c2_36 = arith.constant 2 : index
    %c0_37 = arith.constant 0 : index
    %c1_38 = arith.constant 1 : index
    %c0_39 = arith.constant 0 : index
    %27 = vector.load %arg1[%c0_35, %c2_36, %c0_37, %c1_38, %c0_39] : memref<1x4x9x9x8xf32, #tpu.memory_space<vmem>>, vector<1x1x8x8x8xf32>
    %28 = vector.shape_cast %27 : vector<1x1x8x8x8xf32> to vector<8x8x8xf32>
    %29 = vector.shape_cast %28 : vector<8x8x8xf32> to vector<64x8xf32>
    %30 = tpu.concatenate %20, %23, %26, %29 in 0 : vector<64x8xf32>, vector<64x8xf32>, vector<64x8xf32>, vector<64x8xf32> -> vector<256x8xf32>
    %c1_40 = arith.constant 1 : index
    %c0_41 = arith.constant 0 : index
    %c0_42 = arith.constant 0 : index
    %31 = vector.load %arg2[%c1_40, %c0_41, %c0_42] : memref<9x8x32xf32, #tpu.memory_space<vmem>>, vector<1x8x32xf32>
    %32 = vector.shape_cast %31 : vector<1x8x32xf32> to vector<8x32xf32>
    %cst_43 = arith.constant dense<0.000000e+00> : vector<256x32xf32>
    %33 = tpu.matmul %30, %32, %cst_43 {dimension_numbers = #tpu.dot_dimension_numbers<[1], [0], [0], [1], [0, 0, 1, 1], [], []>} : vector<256x8xf32>, vector<8x32xf32>, vector<256x32xf32> -> vector<256x32xf32>
    %34 = arith.addf %17, %33 : vector<256x32xf32>
    %c0_44 = arith.constant 0 : index
    %c0_45 = arith.constant 0 : index
    %c0_46 = arith.constant 0 : index
    %c1_47 = arith.constant 1 : index
    %c0_48 = arith.constant 0 : index
    %35 = vector.load %arg1[%c0_44, %c0_45, %c0_46, %c1_47, %c0_48] : memref<1x4x9x9x8xf32, #tpu.memory_space<vmem>>, vector<1x1x8x8x8xf32>
    %36 = vector.shape_cast %35 : vector<1x1x8x8x8xf32> to vector<8x8x8xf32>
    %37 = vector.shape_cast %36 : vector<8x8x8xf32> to vector<64x8xf32>
    %c0_49 = arith.constant 0 : index
    %c1_50 = arith.constant 1 : index
    %c0_51 = arith.constant 0 : index
    %c1_52 = arith.constant 1 : index
    %c0_53 = arith.constant 0 : index
    %38 = vector.load %arg1[%c0_49, %c1_50, %c0_51, %c1_52, %c0_53] : memref<1x4x9x9x8xf32, #tpu.memory_space<vmem>>, vector<1x1x8x8x8xf32>
    %39 = vector.shape_cast %38 : vector<1x1x8x8x8xf32> to vector<8x8x8xf32>
    %40 = vector.shape_cast %39 : vector<8x8x8xf32> to vector<64x8xf32>
    %c0_54 = arith.constant 0 : index
    %c2_55 = arith.constant 2 : index
    %c0_56 = arith.constant 0 : index
    %c1_57 = arith.constant 1 : index
    %c0_58 = arith.constant 0 : index
    %41 = vector.load %arg1[%c0_54, %c2_55, %c0_56, %c1_57, %c0_58] : memref<1x4x9x9x8xf32, #tpu.memory_space<vmem>>, vector<1x1x8x8x8xf32>
    %42 = vector.shape_cast %41 : vector<1x1x8x8x8xf32> to vector<8x8x8xf32>
    %43 = vector.shape_cast %42 : vector<8x8x8xf32> to vector<64x8xf32>
    %c0_59 = arith.constant 0 : index
    %c3_60 = arith.constant 3 : index
    %c0_61 = arith.constant 0 : index
    %c1_62 = arith.constant 1 : index
    %c0_63 = arith.constant 0 : index
    %44 = vector.load %arg1[%c0_59, %c3_60, %c0_61, %c1_62, %c0_63] : memref<1x4x9x9x8xf32, #tpu.memory_space<vmem>>, vector<1x1x8x8x8xf32>
    %45 = vector.shape_cast %44 : vector<1x1x8x8x8xf32> to vector<8x8x8xf32>
    %46 = vector.shape_cast %45 : vector<8x8x8xf32> to vector<64x8xf32>
    %47 = tpu.concatenate %37, %40, %43, %46 in 0 : vector<64x8xf32>, vector<64x8xf32>, vector<64x8xf32>, vector<64x8xf32> -> vector<256x8xf32>
    %c2_64 = arith.constant 2 : index
    %c0_65 = arith.constant 0 : index
    %c0_66 = arith.constant 0 : index
    %48 = vector.load %arg2[%c2_64, %c0_65, %c0_66] : memref<9x8x32xf32, #tpu.memory_space<vmem>>, vector<1x8x32xf32>
    %49 = vector.shape_cast %48 : vector<1x8x32xf32> to vector<8x32xf32>
    %cst_67 = arith.constant dense<0.000000e+00> : vector<256x32xf32>
    %50 = tpu.matmul %47, %49, %cst_67 {dimension_numbers = #tpu.dot_dimension_numbers<[1], [0], [0], [1], [0, 0, 1, 1], [], []>} : vector<256x8xf32>, vector<8x32xf32>, vector<256x32xf32> -> vector<256x32xf32>
    %51 = arith.addf %34, %50 : vector<256x32xf32>
    %c0_68 = arith.constant 0 : index
    %c2_69 = arith.constant 2 : index
    %c0_70 = arith.constant 0 : index
    %c0_71 = arith.constant 0 : index
    %c0_72 = arith.constant 0 : index
    %52 = vector.load %arg1[%c0_68, %c2_69, %c0_70, %c0_71, %c0_72] : memref<1x4x9x9x8xf32, #tpu.memory_space<vmem>>, vector<1x1x8x8x8xf32>
    %53 = vector.shape_cast %52 : vector<1x1x8x8x8xf32> to vector<8x8x8xf32>
    %54 = vector.shape_cast %53 : vector<8x8x8xf32> to vector<64x8xf32>
    %c0_73 = arith.constant 0 : index
    %c3_74 = arith.constant 3 : index
    %c0_75 = arith.constant 0 : index
    %c0_76 = arith.constant 0 : index
    %c0_77 = arith.constant 0 : index
    %55 = vector.load %arg1[%c0_73, %c3_74, %c0_75, %c0_76, %c0_77] : memref<1x4x9x9x8xf32, #tpu.memory_space<vmem>>, vector<1x1x8x8x8xf32>
    %56 = vector.shape_cast %55 : vector<1x1x8x8x8xf32> to vector<8x8x8xf32>
    %57 = vector.shape_cast %56 : vector<8x8x8xf32> to vector<64x8xf32>
    %c0_78 = arith.constant 0 : index
    %c0_79 = arith.constant 0 : index
    %c1_80 = arith.constant 1 : index
    %c0_81 = arith.constant 0 : index
    %c0_82 = arith.constant 0 : index
    %58 = vector.load %arg1[%c0_78, %c0_79, %c1_80, %c0_81, %c0_82] : memref<1x4x9x9x8xf32, #tpu.memory_space<vmem>>, vector<1x1x8x8x8xf32>
    %59 = vector.shape_cast %58 : vector<1x1x8x8x8xf32> to vector<8x8x8xf32>
    %60 = vector.shape_cast %59 : vector<8x8x8xf32> to vector<64x8xf32>
    %c0_83 = arith.constant 0 : index
    %c1_84 = arith.constant 1 : index
    %c1_85 = arith.constant 1 : index
    %c0_86 = arith.constant 0 : index
    %c0_87 = arith.constant 0 : index
    %61 = vector.load %arg1[%c0_83, %c1_84, %c1_85, %c0_86, %c0_87] : memref<1x4x9x9x8xf32, #tpu.memory_space<vmem>>, vector<1x1x8x8x8xf32>
    %62 = vector.shape_cast %61 : vector<1x1x8x8x8xf32> to vector<8x8x8xf32>
    %63 = vector.shape_cast %62 : vector<8x8x8xf32> to vector<64x8xf32>
    %64 = tpu.concatenate %54, %57, %60, %63 in 0 : vector<64x8xf32>, vector<64x8xf32>, vector<64x8xf32>, vector<64x8xf32> -> vector<256x8xf32>
    %c3_88 = arith.constant 3 : index
    %c0_89 = arith.constant 0 : index
    %c0_90 = arith.constant 0 : index
    %65 = vector.load %arg2[%c3_88, %c0_89, %c0_90] : memref<9x8x32xf32, #tpu.memory_space<vmem>>, vector<1x8x32xf32>
    %66 = vector.shape_cast %65 : vector<1x8x32xf32> to vector<8x32xf32>
    %cst_91 = arith.constant dense<0.000000e+00> : vector<256x32xf32>
    %67 = tpu.matmul %64, %66, %cst_91 {dimension_numbers = #tpu.dot_dimension_numbers<[1], [0], [0], [1], [0, 0, 1, 1], [], []>} : vector<256x8xf32>, vector<8x32xf32>, vector<256x32xf32> -> vector<256x32xf32>
    %68 = arith.addf %51, %67 : vector<256x32xf32>
    %c0_92 = arith.constant 0 : index
    %c3_93 = arith.constant 3 : index
    %c0_94 = arith.constant 0 : index
    %c0_95 = arith.constant 0 : index
    %c0_96 = arith.constant 0 : index
    %69 = vector.load %arg1[%c0_92, %c3_93, %c0_94, %c0_95, %c0_96] : memref<1x4x9x9x8xf32, #tpu.memory_space<vmem>>, vector<1x1x8x8x8xf32>
    %70 = vector.shape_cast %69 : vector<1x1x8x8x8xf32> to vector<8x8x8xf32>
    %71 = vector.shape_cast %70 : vector<8x8x8xf32> to vector<64x8xf32>
    %c0_97 = arith.constant 0 : index
    %c2_98 = arith.constant 2 : index
    %c0_99 = arith.constant 0 : index
    %c1_100 = arith.constant 1 : index
    %c0_101 = arith.constant 0 : index
    %72 = vector.load %arg1[%c0_97, %c2_98, %c0_99, %c1_100, %c0_101] : memref<1x4x9x9x8xf32, #tpu.memory_space<vmem>>, vector<1x1x8x8x8xf32>
    %73 = vector.shape_cast %72 : vector<1x1x8x8x8xf32> to vector<8x8x8xf32>
    %74 = vector.shape_cast %73 : vector<8x8x8xf32> to vector<64x8xf32>
    %c0_102 = arith.constant 0 : index
    %c1_103 = arith.constant 1 : index
    %c1_104 = arith.constant 1 : index
    %c0_105 = arith.constant 0 : index
    %c0_106 = arith.constant 0 : index
    %75 = vector.load %arg1[%c0_102, %c1_103, %c1_104, %c0_105, %c0_106] : memref<1x4x9x9x8xf32, #tpu.memory_space<vmem>>, vector<1x1x8x8x8xf32>
    %76 = vector.shape_cast %75 : vector<1x1x8x8x8xf32> to vector<8x8x8xf32>
    %77 = vector.shape_cast %76 : vector<8x8x8xf32> to vector<64x8xf32>
    %c0_107 = arith.constant 0 : index
    %c0_108 = arith.constant 0 : index
    %c1_109 = arith.constant 1 : index
    %c1_110 = arith.constant 1 : index
    %c0_111 = arith.constant 0 : index
    %78 = vector.load %arg1[%c0_107, %c0_108, %c1_109, %c1_110, %c0_111] : memref<1x4x9x9x8xf32, #tpu.memory_space<vmem>>, vector<1x1x8x8x8xf32>
    %79 = vector.shape_cast %78 : vector<1x1x8x8x8xf32> to vector<8x8x8xf32>
    %80 = vector.shape_cast %79 : vector<8x8x8xf32> to vector<64x8xf32>
    %81 = tpu.concatenate %71, %74, %77, %80 in 0 : vector<64x8xf32>, vector<64x8xf32>, vector<64x8xf32>, vector<64x8xf32> -> vector<256x8xf32>
    %c4 = arith.constant 4 : index
    %c0_112 = arith.constant 0 : index
    %c0_113 = arith.constant 0 : index
    %82 = vector.load %arg2[%c4, %c0_112, %c0_113] : memref<9x8x32xf32, #tpu.memory_space<vmem>>, vector<1x8x32xf32>
    %83 = vector.shape_cast %82 : vector<1x8x32xf32> to vector<8x32xf32>
    %cst_114 = arith.constant dense<0.000000e+00> : vector<256x32xf32>
    %84 = tpu.matmul %81, %83, %cst_114 {dimension_numbers = #tpu.dot_dimension_numbers<[1], [0], [0], [1], [0, 0, 1, 1], [], []>} : vector<256x8xf32>, vector<8x32xf32>, vector<256x32xf32> -> vector<256x32xf32>
    %85 = arith.addf %68, %84 : vector<256x32xf32>
    %c0_115 = arith.constant 0 : index
    %c2_116 = arith.constant 2 : index
    %c0_117 = arith.constant 0 : index
    %c1_118 = arith.constant 1 : index
    %c0_119 = arith.constant 0 : index
    %86 = vector.load %arg1[%c0_115, %c2_116, %c0_117, %c1_118, %c0_119] : memref<1x4x9x9x8xf32, #tpu.memory_space<vmem>>, vector<1x1x8x8x8xf32>
    %87 = vector.shape_cast %86 : vector<1x1x8x8x8xf32> to vector<8x8x8xf32>
    %88 = vector.shape_cast %87 : vector<8x8x8xf32> to vector<64x8xf32>
    %c0_120 = arith.constant 0 : index
    %c3_121 = arith.constant 3 : index
    %c0_122 = arith.constant 0 : index
    %c1_123 = arith.constant 1 : index
    %c0_124 = arith.constant 0 : index
    %89 = vector.load %arg1[%c0_120, %c3_121, %c0_122, %c1_123, %c0_124] : memref<1x4x9x9x8xf32, #tpu.memory_space<vmem>>, vector<1x1x8x8x8xf32>
    %90 = vector.shape_cast %89 : vector<1x1x8x8x8xf32> to vector<8x8x8xf32>
    %91 = vector.shape_cast %90 : vector<8x8x8xf32> to vector<64x8xf32>
    %c0_125 = arith.constant 0 : index
    %c0_126 = arith.constant 0 : index
    %c1_127 = arith.constant 1 : index
    %c1_128 = arith.constant 1 : index
    %c0_129 = arith.constant 0 : index
    %92 = vector.load %arg1[%c0_125, %c0_126, %c1_127, %c1_128, %c0_129] : memref<1x4x9x9x8xf32, #tpu.memory_space<vmem>>, vector<1x1x8x8x8xf32>
    %93 = vector.shape_cast %92 : vector<1x1x8x8x8xf32> to vector<8x8x8xf32>
    %94 = vector.shape_cast %93 : vector<8x8x8xf32> to vector<64x8xf32>
    %c0_130 = arith.constant 0 : index
    %c1_131 = arith.constant 1 : index
    %c1_132 = arith.constant 1 : index
    %c1_133 = arith.constant 1 : index
    %c0_134 = arith.constant 0 : index
    %95 = vector.load %arg1[%c0_130, %c1_131, %c1_132, %c1_133, %c0_134] : memref<1x4x9x9x8xf32, #tpu.memory_space<vmem>>, vector<1x1x8x8x8xf32>
    %96 = vector.shape_cast %95 : vector<1x1x8x8x8xf32> to vector<8x8x8xf32>
    %97 = vector.shape_cast %96 : vector<8x8x8xf32> to vector<64x8xf32>
    %98 = tpu.concatenate %88, %91, %94, %97 in 0 : vector<64x8xf32>, vector<64x8xf32>, vector<64x8xf32>, vector<64x8xf32> -> vector<256x8xf32>
    %c5 = arith.constant 5 : index
    %c0_135 = arith.constant 0 : index
    %c0_136 = arith.constant 0 : index
    %99 = vector.load %arg2[%c5, %c0_135, %c0_136] : memref<9x8x32xf32, #tpu.memory_space<vmem>>, vector<1x8x32xf32>
    %100 = vector.shape_cast %99 : vector<1x8x32xf32> to vector<8x32xf32>
    %cst_137 = arith.constant dense<0.000000e+00> : vector<256x32xf32>
    %101 = tpu.matmul %98, %100, %cst_137 {dimension_numbers = #tpu.dot_dimension_numbers<[1], [0], [0], [1], [0, 0, 1, 1], [], []>} : vector<256x8xf32>, vector<8x32xf32>, vector<256x32xf32> -> vector<256x32xf32>
    %102 = arith.addf %85, %101 : vector<256x32xf32>
    %c0_138 = arith.constant 0 : index
    %c0_139 = arith.constant 0 : index
    %c1_140 = arith.constant 1 : index
    %c0_141 = arith.constant 0 : index
    %c0_142 = arith.constant 0 : index
    %103 = vector.load %arg1[%c0_138, %c0_139, %c1_140, %c0_141, %c0_142] : memref<1x4x9x9x8xf32, #tpu.memory_space<vmem>>, vector<1x1x8x8x8xf32>
    %104 = vector.shape_cast %103 : vector<1x1x8x8x8xf32> to vector<8x8x8xf32>
    %105 = vector.shape_cast %104 : vector<8x8x8xf32> to vector<64x8xf32>
    %c0_143 = arith.constant 0 : index
    %c1_144 = arith.constant 1 : index
    %c1_145 = arith.constant 1 : index
    %c0_146 = arith.constant 0 : index
    %c0_147 = arith.constant 0 : index
    %106 = vector.load %arg1[%c0_143, %c1_144, %c1_145, %c0_146, %c0_147] : memref<1x4x9x9x8xf32, #tpu.memory_space<vmem>>, vector<1x1x8x8x8xf32>
    %107 = vector.shape_cast %106 : vector<1x1x8x8x8xf32> to vector<8x8x8xf32>
    %108 = vector.shape_cast %107 : vector<8x8x8xf32> to vector<64x8xf32>
    %c0_148 = arith.constant 0 : index
    %c2_149 = arith.constant 2 : index
    %c1_150 = arith.constant 1 : index
    %c0_151 = arith.constant 0 : index
    %c0_152 = arith.constant 0 : index
    %109 = vector.load %arg1[%c0_148, %c2_149, %c1_150, %c0_151, %c0_152] : memref<1x4x9x9x8xf32, #tpu.memory_space<vmem>>, vector<1x1x8x8x8xf32>
    %110 = vector.shape_cast %109 : vector<1x1x8x8x8xf32> to vector<8x8x8xf32>
    %111 = vector.shape_cast %110 : vector<8x8x8xf32> to vector<64x8xf32>
    %c0_153 = arith.constant 0 : index
    %c3_154 = arith.constant 3 : index
    %c1_155 = arith.constant 1 : index
    %c0_156 = arith.constant 0 : index
    %c0_157 = arith.constant 0 : index
    %112 = vector.load %arg1[%c0_153, %c3_154, %c1_155, %c0_156, %c0_157] : memref<1x4x9x9x8xf32, #tpu.memory_space<vmem>>, vector<1x1x8x8x8xf32>
    %113 = vector.shape_cast %112 : vector<1x1x8x8x8xf32> to vector<8x8x8xf32>
    %114 = vector.shape_cast %113 : vector<8x8x8xf32> to vector<64x8xf32>
    %115 = tpu.concatenate %105, %108, %111, %114 in 0 : vector<64x8xf32>, vector<64x8xf32>, vector<64x8xf32>, vector<64x8xf32> -> vector<256x8xf32>
    %c6 = arith.constant 6 : index
    %c0_158 = arith.constant 0 : index
    %c0_159 = arith.constant 0 : index
    %116 = vector.load %arg2[%c6, %c0_158, %c0_159] : memref<9x8x32xf32, #tpu.memory_space<vmem>>, vector<1x8x32xf32>
    %117 = vector.shape_cast %116 : vector<1x8x32xf32> to vector<8x32xf32>
    %cst_160 = arith.constant dense<0.000000e+00> : vector<256x32xf32>
    %118 = tpu.matmul %115, %117, %cst_160 {dimension_numbers = #tpu.dot_dimension_numbers<[1], [0], [0], [1], [0, 0, 1, 1], [], []>} : vector<256x8xf32>, vector<8x32xf32>, vector<256x32xf32> -> vector<256x32xf32>
    %119 = arith.addf %102, %118 : vector<256x32xf32>
    %c0_161 = arith.constant 0 : index
    %c1_162 = arith.constant 1 : index
    %c1_163 = arith.constant 1 : index
    %c0_164 = arith.constant 0 : index
    %c0_165 = arith.constant 0 : index
    %120 = vector.load %arg1[%c0_161, %c1_162, %c1_163, %c0_164, %c0_165] : memref<1x4x9x9x8xf32, #tpu.memory_space<vmem>>, vector<1x1x8x8x8xf32>
    %121 = vector.shape_cast %120 : vector<1x1x8x8x8xf32> to vector<8x8x8xf32>
    %122 = vector.shape_cast %121 : vector<8x8x8xf32> to vector<64x8xf32>
    %c0_166 = arith.constant 0 : index
    %c0_167 = arith.constant 0 : index
    %c1_168 = arith.constant 1 : index
    %c1_169 = arith.constant 1 : index
    %c0_170 = arith.constant 0 : index
    %123 = vector.load %arg1[%c0_166, %c0_167, %c1_168, %c1_169, %c0_170] : memref<1x4x9x9x8xf32, #tpu.memory_space<vmem>>, vector<1x1x8x8x8xf32>
    %124 = vector.shape_cast %123 : vector<1x1x8x8x8xf32> to vector<8x8x8xf32>
    %125 = vector.shape_cast %124 : vector<8x8x8xf32> to vector<64x8xf32>
    %c0_171 = arith.constant 0 : index
    %c3_172 = arith.constant 3 : index
    %c1_173 = arith.constant 1 : index
    %c0_174 = arith.constant 0 : index
    %c0_175 = arith.constant 0 : index
    %126 = vector.load %arg1[%c0_171, %c3_172, %c1_173, %c0_174, %c0_175] : memref<1x4x9x9x8xf32, #tpu.memory_space<vmem>>, vector<1x1x8x8x8xf32>
    %127 = vector.shape_cast %126 : vector<1x1x8x8x8xf32> to vector<8x8x8xf32>
    %128 = vector.shape_cast %127 : vector<8x8x8xf32> to vector<64x8xf32>
    %c0_176 = arith.constant 0 : index
    %c2_177 = arith.constant 2 : index
    %c1_178 = arith.constant 1 : index
    %c1_179 = arith.constant 1 : index
    %c0_180 = arith.constant 0 : index
    %129 = vector.load %arg1[%c0_176, %c2_177, %c1_178, %c1_179, %c0_180] : memref<1x4x9x9x8xf32, #tpu.memory_space<vmem>>, vector<1x1x8x8x8xf32>
    %130 = vector.shape_cast %129 : vector<1x1x8x8x8xf32> to vector<8x8x8xf32>
    %131 = vector.shape_cast %130 : vector<8x8x8xf32> to vector<64x8xf32>
    %132 = tpu.concatenate %122, %125, %128, %131 in 0 : vector<64x8xf32>, vector<64x8xf32>, vector<64x8xf32>, vector<64x8xf32> -> vector<256x8xf32>
    %c7 = arith.constant 7 : index
    %c0_181 = arith.constant 0 : index
    %c0_182 = arith.constant 0 : index
    %133 = vector.load %arg2[%c7, %c0_181, %c0_182] : memref<9x8x32xf32, #tpu.memory_space<vmem>>, vector<1x8x32xf32>
    %134 = vector.shape_cast %133 : vector<1x8x32xf32> to vector<8x32xf32>
    %cst_183 = arith.constant dense<0.000000e+00> : vector<256x32xf32>
    %135 = tpu.matmul %132, %134, %cst_183 {dimension_numbers = #tpu.dot_dimension_numbers<[1], [0], [0], [1], [0, 0, 1, 1], [], []>} : vector<256x8xf32>, vector<8x32xf32>, vector<256x32xf32> -> vector<256x32xf32>
    %136 = arith.addf %119, %135 : vector<256x32xf32>
    %c0_184 = arith.constant 0 : index
    %c0_185 = arith.constant 0 : index
    %c1_186 = arith.constant 1 : index
    %c1_187 = arith.constant 1 : index
    %c0_188 = arith.constant 0 : index
    %137 = vector.load %arg1[%c0_184, %c0_185, %c1_186, %c1_187, %c0_188] : memref<1x4x9x9x8xf32, #tpu.memory_space<vmem>>, vector<1x1x8x8x8xf32>
    %138 = vector.shape_cast %137 : vector<1x1x8x8x8xf32> to vector<8x8x8xf32>
    %139 = vector.shape_cast %138 : vector<8x8x8xf32> to vector<64x8xf32>
    %c0_189 = arith.constant 0 : index
    %c1_190 = arith.constant 1 : index
    %c1_191 = arith.constant 1 : index
    %c1_192 = arith.constant 1 : index
    %c0_193 = arith.constant 0 : index
    %140 = vector.load %arg1[%c0_189, %c1_190, %c1_191, %c1_192, %c0_193] : memref<1x4x9x9x8xf32, #tpu.memory_space<vmem>>, vector<1x1x8x8x8xf32>
    %141 = vector.shape_cast %140 : vector<1x1x8x8x8xf32> to vector<8x8x8xf32>
    %142 = vector.shape_cast %141 : vector<8x8x8xf32> to vector<64x8xf32>
    %c0_194 = arith.constant 0 : index
    %c2_195 = arith.constant 2 : index
    %c1_196 = arith.constant 1 : index
    %c1_197 = arith.constant 1 : index
    %c0_198 = arith.constant 0 : index
    %143 = vector.load %arg1[%c0_194, %c2_195, %c1_196, %c1_197, %c0_198] : memref<1x4x9x9x8xf32, #tpu.memory_space<vmem>>, vector<1x1x8x8x8xf32>
    %144 = vector.shape_cast %143 : vector<1x1x8x8x8xf32> to vector<8x8x8xf32>
    %145 = vector.shape_cast %144 : vector<8x8x8xf32> to vector<64x8xf32>
    %c0_199 = arith.constant 0 : index
    %c3_200 = arith.constant 3 : index
    %c1_201 = arith.constant 1 : index
    %c1_202 = arith.constant 1 : index
    %c0_203 = arith.constant 0 : index
    %146 = vector.load %arg1[%c0_199, %c3_200, %c1_201, %c1_202, %c0_203] : memref<1x4x9x9x8xf32, #tpu.memory_space<vmem>>, vector<1x1x8x8x8xf32>
    %147 = vector.shape_cast %146 : vector<1x1x8x8x8xf32> to vector<8x8x8xf32>
    %148 = vector.shape_cast %147 : vector<8x8x8xf32> to vector<64x8xf32>
    %149 = tpu.concatenate %139, %142, %145, %148 in 0 : vector<64x8xf32>, vector<64x8xf32>, vector<64x8xf32>, vector<64x8xf32> -> vector<256x8xf32>
    %c8 = arith.constant 8 : index
    %c0_204 = arith.constant 0 : index
    %c0_205 = arith.constant 0 : index
    %150 = vector.load %arg2[%c8, %c0_204, %c0_205] : memref<9x8x32xf32, #tpu.memory_space<vmem>>, vector<1x8x32xf32>
    %151 = vector.shape_cast %150 : vector<1x8x32xf32> to vector<8x32xf32>
    %cst_206 = arith.constant dense<0.000000e+00> : vector<256x32xf32>
    %152 = tpu.matmul %149, %151, %cst_206 {dimension_numbers = #tpu.dot_dimension_numbers<[1], [0], [0], [1], [0, 0, 1, 1], [], []>} : vector<256x8xf32>, vector<8x32xf32>, vector<256x32xf32> -> vector<256x32xf32>
    %153 = arith.addf %136, %152 : vector<256x32xf32>
    %154 = vector.shape_cast %153 : vector<256x32xf32> to vector<4x64x32xf32>
    %155 = vector.extract_strided_slice %154 {offsets = [0, 0, 0], sizes = [1, 64, 32], strides = [1, 1, 1]} : vector<4x64x32xf32> to vector<1x64x32xf32>
    %156 = vector.shape_cast %155 : vector<1x64x32xf32> to vector<64x32xf32>
    %157 = vector.extract_strided_slice %154 {offsets = [1, 0, 0], sizes = [1, 64, 32], strides = [1, 1, 1]} : vector<4x64x32xf32> to vector<1x64x32xf32>
    %158 = vector.shape_cast %157 : vector<1x64x32xf32> to vector<64x32xf32>
    %159 = arith.maximumf %156, %158 : vector<64x32xf32>
    %160 = vector.extract_strided_slice %154 {offsets = [2, 0, 0], sizes = [1, 64, 32], strides = [1, 1, 1]} : vector<4x64x32xf32> to vector<1x64x32xf32>
    %161 = vector.shape_cast %160 : vector<1x64x32xf32> to vector<64x32xf32>
    %162 = vector.extract_strided_slice %154 {offsets = [3, 0, 0], sizes = [1, 64, 32], strides = [1, 1, 1]} : vector<4x64x32xf32> to vector<1x64x32xf32>
    %163 = vector.shape_cast %162 : vector<1x64x32xf32> to vector<64x32xf32>
    %164 = arith.maximumf %161, %163 : vector<64x32xf32>
    %165 = arith.maximumf %159, %164 : vector<64x32xf32>
    %c0_207 = arith.constant 0 : index
    %c0_208 = arith.constant 0 : index
    %166 = vector.load %arg3[%c0_207, %c0_208] : memref<1x32xf32, #tpu.memory_space<vmem>>, vector<1x32xf32>
    %167 = vector.broadcast %166 : vector<1x32xf32> to vector<64x32xf32>
    %168 = arith.addf %165, %167 : vector<64x32xf32>
    %cst_209 = arith.constant 0.000000e+00 : f32
    %169 = vector.broadcast %cst_209 : f32 to vector<64x32xf32>
    %170 = arith.maximumf %168, %169 : vector<64x32xf32>
    %171 = arith.truncf %170 : vector<64x32xf32> to vector<64x32xbf16>
    %c0_210 = arith.constant 0 : index
    %c0_211 = arith.constant 0 : index
    %c0_212 = arith.constant 0 : index
    %172 = vector.load %arg4[%c0_210, %c0_211, %c0_212] : memref<1x64x32xbf16, #tpu.memory_space<vmem>>, vector<1x64x32xbf16>
    %173 = vector.shape_cast %172 : vector<1x64x32xbf16> to vector<64x32xbf16>
    %174 = vector.shape_cast %171 : vector<64x32xbf16> to vector<1x64x32xbf16>
    tpu.vector_store %arg4[%c0_210, %c0_211, %c0_212], %174 {strides = array<i32>} : memref<1x64x32xbf16, #tpu.memory_space<vmem>>, vector<1x64x32xbf16>,
    return
  }
  func.func @transform_0(%arg0: i32) -> (i32, i32, i32, i32, i32) {
    %c0_i32 = arith.constant 0 : i32
    %c0_i32_0 = arith.constant 0 : i32
    %c0_i32_1 = arith.constant 0 : i32
    %c0_i32_2 = arith.constant 0 : i32
    %c0_i32_3 = arith.constant 0 : i32
    return %arg0, %c0_i32, %c0_i32_0, %c0_i32_1, %c0_i32_2 : i32, i32, i32, i32, i32
  }
  func.func @transform_1(%arg0: i32) -> (i32, i32, i32) {
    %c0_i32 = arith.constant 0 : i32
    %c0_i32_0 = arith.constant 0 : i32
    %c0_i32_1 = arith.constant 0 : i32
    %c0_i32_2 = arith.constant 0 : i32
    return %c0_i32, %c0_i32_0, %c0_i32_1 : i32, i32, i32
  }
  func.func @transform_2(%arg0: i32) -> (i32, i32) {
    %c0_i32 = arith.constant 0 : i32
    %c0_i32_0 = arith.constant 0 : i32
    %c0_i32_1 = arith.constant 0 : i32
    return %c0_i32, %c0_i32_0 : i32, i32
  }
  func.func @transform_3(%arg0: i32) -> (i32, i32, i32) {
    %c0_i32 = arith.constant 0 : i32
    %c0_i32_0 = arith.constant 0 : i32
    %c0_i32_1 = arith.constant 0 : i32
    return %arg0, %c0_i32, %c0_i32_0 : i32, i32, i32
  }
}

module attributes {stable_mosaic.version = 11 : i64} {
  func.func @fc_kernel(%arg0: memref<2x2048xbf16, #tpu.memory_space<vmem>>, %arg1: memref<2048x128xbf16, #tpu.memory_space<vmem>>, %arg2: memref<1x128xf32, #tpu.memory_space<vmem>>, %arg3: memref<2x128xf32, #tpu.memory_space<vmem>>) attributes {dimension_semantics = [], scalar_prefetch = 0 : i64, scratch_operands = 0 : i64, tpu.core_type = #tpu.core_type<tc>} {
    %c0 = arith.constant 0 : index
    %c0_0 = arith.constant 0 : index
    %0 = vector.load %arg0[%c0, %c0_0] : memref<2x2048xbf16, #tpu.memory_space<vmem>>, vector<2x2048xbf16>
    %c0_1 = arith.constant 0 : index
    %c0_2 = arith.constant 0 : index
    %1 = vector.load %arg1[%c0_1, %c0_2] : memref<2048x128xbf16, #tpu.memory_space<vmem>>, vector<2048x128xbf16>
    %cst = arith.constant dense<0.000000e+00> : vector<2x128xf32>
    %2 = tpu.matmul %0, %1, %cst {dimension_numbers = #tpu.dot_dimension_numbers<[1], [0], [0], [1], [0, 0, 1, 1], [], []>} : vector<2x2048xbf16>, vector<2048x128xbf16>, vector<2x128xf32> -> vector<2x128xf32>
    %c0_3 = arith.constant 0 : index
    %c0_4 = arith.constant 0 : index
    %3 = vector.load %arg2[%c0_3, %c0_4] : memref<1x128xf32, #tpu.memory_space<vmem>>, vector<1x128xf32>
    %4 = vector.broadcast %3 : vector<1x128xf32> to vector<2x128xf32>
    %5 = arith.addf %2, %4 : vector<2x128xf32>
    %c0_5 = arith.constant 0 : index
    %c0_6 = arith.constant 0 : index
    %6 = vector.load %arg3[%c0_5, %c0_6] : memref<2x128xf32, #tpu.memory_space<vmem>>, vector<2x128xf32>
    tpu.vector_store %arg3[%c0_5, %c0_6], %5 {strides = array<i32>} : memref<2x128xf32, #tpu.memory_space<vmem>>, vector<2x128xf32>,
    return
  }
}

</mosaic_0001>

<bundles_post_ra>
// kernel: cnn_forward.3
= control target key start
LH: loop header
LB: loop body
LE: loop exit
PB: predicated region body
PF: predicated region fallthrough
CT: control target
= control target key end

     0   :  { %v287_v28 = vlaneseq  ;;  %v1961_v36 = vmov 1966171168   ;;  %s2412_s0 = inlined_call_operand.vmem [shape: bf16[2,2048], index: 0, kind: input, shape index: {}]   ;;  %s2413_s1 = inlined_call_operand.vmem [shape: bf16[2048,128], index: 1, kind: input, shape index: {}]   ;;  %s2414_s2 = inlined_call_operand.vmem [shape: f32[1,128], index: 2, kind: input, shape index: {}]   ;;  %s2415_s3 = inlined_call_operand.hbm [shape: f32[2,128], index: 3, kind: output, shape index: {}]  }
   0x1   :  { %v1807_v0 = vld [vmem:[%s2413_s1 + $0x40] sm:$0xff]   ;;  %v1811_v4 = vld [vmem:[%s2413_s1 + $0x48] sm:$0xff]   ;;  %v1815_v8 = vld [vmem:[%s2413_s1 + $0x50] sm:$0xff]   ;;  %v285_v37 = vunpack.c.l.s4 %v1961_v36 }
   0x2   :  { %v1808_v1 = vld [vmem:[%s2413_s1 + $0xc0] sm:$0xff]   ;;  %1629 = vmatprep.subr.bf16.mxu0 %v1807_v0  ;;  %v1812_v5 = vld [vmem:[%s2413_s1 + $0xc8] sm:$0xff]   ;;  %v1816_v9 = vld [vmem:[%s2413_s1 + $0xd0] sm:$0xff]   ;;  %v288_v33 = vshrl.u32 %v287_v28, 7 }
   0x3   :  { %v1809_v2 = vld [vmem:[%s2413_s1] sm:$0xff]   ;;  %1651 = vmatprep.subr.bf16.mxu1 %v1808_v1  ;;  %v1813_v6 = vld [vmem:[%s2413_s1 + $0x8] sm:$0xff]   ;;  %v1817_v10 = vld [vmem:[%s2413_s1 + $0x10] sm:$0xff]   ;;  %v286_v40 = vunpack.c.0.s8 %v285_v37 }
   0x4   :  { %v1810_v3 = vld [vmem:[%s2413_s1 + $0x80] sm:$0xff]   ;;  %1630 = vmatpush3.bf16.msra.mxu0 %v1809_v2  ;;  %v1814_v7 = vld [vmem:[%s2413_s1 + $0x88] sm:$0xff]   ;;  %v1818_v11 = vld [vmem:[%s2413_s1 + $0x90] sm:$0xff]  }
   0x5   :  { %1652 = vmatpush3.bf16.msra.mxu1 %v1810_v3  ;;  %1631 = vmatprep.subr.bf16.mxu0 %v1811_v4  ;;  %v1819_v12 = vld [vmem:[%s2413_s1 + $0x58] sm:$0xff]   ;;  %v1823_v16 = vld [vmem:[%s2413_s1 + $0x60] sm:$0xff]   ;;  %v1827_v20 = vld [vmem:[%s2413_s1 + $0x68] sm:$0xff]   ;;  %v2088_v41 = vsub.s32 %v286_v40, %v288_v33 }
   0x6   :  { %1653 = vmatprep.subr.bf16.mxu1 %v1812_v5  ;;  %v1820_v13 = vld [vmem:[%s2413_s1 + $0xd8] sm:$0xff]   ;;  %v1824_v17 = vld [vmem:[%s2413_s1 + $0xe0] sm:$0xff]   ;;  %v1828_v21 = vld [vmem:[%s2413_s1 + $0xe8] sm:$0xff]  }
   0x7   :  { %v1821_v14 = vld [vmem:[%s2413_s1 + $0x18] sm:$0xff]   ;;  %v1825_v18 = vld [vmem:[%s2413_s1 + $0x20] sm:$0xff]   ;;  %v1829_v22 = vld [vmem:[%s2413_s1 + $0x28] sm:$0xff]  }
   0x8   :  { %1632 = vmatpush3.bf16.msra.mxu0 %v1813_v6  ;;  %v1822_v15 = vld [vmem:[%s2413_s1 + $0x98] sm:$0xff]   ;;  %v1826_v19 = vld [vmem:[%s2413_s1 + $0xa0] sm:$0xff]   ;;  %v1830_v23 = vld [vmem:[%s2413_s1 + $0xa8] sm:$0xff]  }
   0x9   :  { %1654 = vmatpush3.bf16.msra.mxu1 %v1814_v7  ;;  %1633 = vmatprep.subr.bf16.mxu0 %v1815_v8  ;;  %v1831_v24 = vld [vmem:[%s2413_s1 + $0x70] sm:$0xff]   ;;  %v1835_v29 = vld [vmem:[%s2413_s1 + $0x78] sm:$0xff]   ;;  %v16_v34 = vld [vmem:[%s2412_s0] sm:$0xff] }
   0xa   :  { %1655 = vmatprep.subr.bf16.mxu1 %v1816_v9  ;;  %v1832_v25 = vld [vmem:[%s2413_s1 + $0xf0] sm:$0xff]   ;;  %v1836_v30 = vld [vmem:[%s2413_s1 + $0xf8] sm:$0xff]   ;;  %v1840_v35 = vld [vmem:[%s2413_s1 + $0x140] sm:$0xff]   ;;  %v283_v39 = vcombine.high %v16_v34, %v16_v34  ;;  %v290_v42 = vrot.slane %v16_v34, %v2088_v41 }
   0xb   :  { %v1833_v26 = vld [vmem:[%s2413_s1 + $0x30] sm:$0xff]   ;;  %v1837_v31 = vld [vmem:[%s2413_s1 + $0x38] sm:$0xff]   ;;  %v1841_v38 = vld [vmem:[%s2413_s1 + $0x1c0] sm:$0xff]  }
   0xc   :  { %1634 = vmatpush3.bf16.msra.mxu0 %v1817_v10  ;;  %v1834_v27 = vld [vmem:[%s2413_s1 + $0xb0] sm:$0xff]   ;;  %v1838_v32 = vld [vmem:[%s2413_s1 + $0xb8] sm:$0xff]   ;;  %v2092_v43 = vrot.slane %v283_v39, %v2088_v41  ;;  %v298_v44 = vcombine.high %v290_v42, %v290_v42  ;;  %v306_v45 = vrot.slane %v290_v42, %v2088_v41  ;;  %v1842_v48 = vld [vmem:[%s2413_s1 + $0x100] sm:$0xff]  }
   0xd   :  { %1656 = vmatpush3.bf16.msra.mxu1 %v1818_v11  ;;  %1635 = vmatprep.subr.bf16.mxu0 %v1819_v12  ;;  %v1844_v51 = vld [vmem:[%s2413_s1 + $0x148] sm:$0xff]   ;;  %v1843_v53 = vld [vmem:[%s2413_s1 + $0x180] sm:$0xff]   ;;  %v1848_v57 = vld [vmem:[%s2413_s1 + $0x150] sm:$0xff]  }
   0xe   :  { %1657 = vmatprep.subr.bf16.mxu1 %v1820_v13  ;;  %v299_v46 = vcombine.high %v2092_v43, %v2092_v43  ;;  %v320_v47 = vrot.slane %v298_v44, %v2088_v41  ;;  %v328_v50 = vcombine.high %v306_v45, %v306_v45  ;;  %v1845_v54 = vld [vmem:[%s2413_s1 + $0x1c8] sm:$0xff]   ;;  %v1849_v59 = vld [vmem:[%s2413_s1 + $0x1d0] sm:$0xff]   ;;  %v1852_v61 = vld [vmem:[%s2413_s1 + $0x158] sm:$0xff]  }
   0xf   :  { %v1846_v56 = vld [vmem:[%s2413_s1 + $0x108] sm:$0xff]   ;;  %v1850_v60 = vld [vmem:[%s2413_s1 + $0x110] sm:$0xff]   ;;  %v1853_v63 = vld [vmem:[%s2413_s1 + $0x1d8] sm:$0xff]  }
  0x10   :  { %1636 = vmatpush3.bf16.msra.mxu0 %v1821_v14  ;;  %v327_v49 = vrot.slane %v299_v46, %v2088_v41  ;;  %1197 = vmatprep.mubr.bf16.mxu0 %v320_v47  ;;  %v330_v52 = vcombine.high %v320_v47, %v320_v47  ;;  %v1847_v58 = vld [vmem:[%s2413_s1 + $0x188] sm:$0xff]   ;;  %v1851_v62 = vld [vmem:[%s2413_s1 + $0x190] sm:$0xff]   ;;  %v1854_v0 = vld [vmem:[%s2413_s1 + $0x118] sm:$0xff]  }
  0x11   :  { %1658 = vmatpush3.bf16.msra.mxu1 %v1822_v15  ;;  %1637 = vmatprep.subr.bf16.mxu0 %v1823_v16  ;;  %v1856_v1 = vld [vmem:[%s2413_s1 + $0x160] sm:$0xff]   ;;  %v1855_v2 = vld [vmem:[%s2413_s1 + $0x198] sm:$0xff]   ;;  %v1860_v5 = vld [vmem:[%s2413_s1 + $0x168] sm:$0xff]  }
  0x12   :  { %1659 = vmatprep.subr.bf16.mxu1 %v1824_v17  ;;  %v331_v55 = vcombine.high %v327_v49, %v327_v49  ;;  %1237 = vmatprep.mubr.bf16.mxu1 %v330_v52  ;;  %v1857_v3 = vld [vmem:[%s2413_s1 + $0x1e0] sm:$0xff]   ;;  %v1861_v7 = vld [vmem:[%s2413_s1 + $0x1e8] sm:$0xff]   ;;  %v1864_v9 = vld [vmem:[%s2413_s1 + $0x170] sm:$0xff]   ;;  %v313_v17 = vrot.slane %v2092_v43, %v2088_v41 }
  0x13   :  { %v1858_v4 = vld [vmem:[%s2413_s1 + $0x120] sm:$0xff]   ;;  %v1862_v8 = vld [vmem:[%s2413_s1 + $0x128] sm:$0xff]   ;;  %v1865_v11 = vld [vmem:[%s2413_s1 + $0x1f0] sm:$0xff]  }
  0x14   :  { %1638 = vmatpush3.bf16.msra.mxu0 %v1825_v18  ;;  %v1859_v6 = vld [vmem:[%s2413_s1 + $0x1a0] sm:$0xff]   ;;  %v1863_v10 = vld [vmem:[%s2413_s1 + $0x1a8] sm:$0xff]   ;;  %v1866_v12 = vld [vmem:[%s2413_s1 + $0x130] sm:$0xff]  }
  0x15   :  { %1660 = vmatpush3.bf16.msra.mxu1 %v1826_v19  ;;  %1639 = vmatprep.subr.bf16.mxu0 %v1827_v20  ;;  %v1868_v13 = vld [vmem:[%s2413_s1 + $0x178] sm:$0xff]   ;;  %v1867_v14 = vld [vmem:[%s2413_s1 + $0x1b0] sm:$0xff]   ;;  %v1872_v18 = vld [vmem:[%s2413_s1 + $0x240] sm:$0xff]  }
  0x16   :  { %1661 = vmatprep.subr.bf16.mxu1 %v1828_v21  ;;  %v1869_v15 = vld [vmem:[%s2413_s1 + $0x1f8] sm:$0xff]   ;;  %v1873_v20 = vld [vmem:[%s2413_s1 + $0x2c0] sm:$0xff]   ;;  %v1879_v28 = vld [vmem:[%s2413_s1 + $0x288] sm:$0xff]  }
  0x17   :  { %v1870_v16 = vld [vmem:[%s2413_s1 + $0x138] sm:$0xff]   ;;  %v1874_v21 = vld [vmem:[%s2413_s1 + $0x200] sm:$0xff]   ;;  %v1892_v39 = vld [vmem:[%s2413_s1 + $0x268] sm:$0xff]  }
  0x18   :  { %1640 = vmatpush3.bf16.msra.mxu0 %v1829_v22  ;;  %v1871_v19 = vld [vmem:[%s2413_s1 + $0x1b8] sm:$0xff]   ;;  %v329_v22 = vcombine.high %v313_v17, %v313_v17  ;;  %v1889_v37 = vld [vmem:[%s2413_s1 + $0x2e0] sm:$0xff]   ;;  %v1893_v42 = vld [vmem:[%s2413_s1 + $0x2e8] sm:$0xff]  }
  0x19   :  { %1662 = vmatpush3.bf16.msra.mxu1 %v1830_v23  ;;  %1641 = vmatprep.subr.bf16.mxu0 %v1831_v24  ;;  %v1876_v23 = vld [vmem:[%s2413_s1 + $0x248] sm:$0xff]   ;;  %v1875_v24 = vld [vmem:[%s2413_s1 + $0x280] sm:$0xff]   ;;  %v1885_v33 = vld [vmem:[%s2413_s1 + $0x2d8] sm:$0xff]  }
  0x1a   :  { %1663 = vmatprep.subr.bf16.mxu1 %v1832_v25  ;;  %v1877_v25 = vld [vmem:[%s2413_s1 + $0x2c8] sm:$0xff]   ;;  %v1886_v34 = vld [vmem:[%s2413_s1 + $0x218] sm:$0xff]   ;;  %v1891_v40 = vld [vmem:[%s2413_s1 + $0x2a0] sm:$0xff]  }
  0x1b   :  { %v1887_v36 = vld [vmem:[%s2413_s1 + $0x298] sm:$0xff]   ;;  %v1894_v43 = vld [vmem:[%s2413_s1 + $0x228] sm:$0xff]   ;;  %v1896_v44 = vld [vmem:[%s2413_s1 + $0x270] sm:$0xff]  }
  0x1c   :  { %1642 = vmatpush3.bf16.msra.mxu0 %v1833_v26  ;;  %v1878_v26 = vld [vmem:[%s2413_s1 + $0x208] sm:$0xff]  }
  0x1d   :  { %1664 = vmatpush3.bf16.msra.mxu1 %v1834_v27  ;;  %1643 = vmatprep.subr.bf16.mxu0 %v1835_v29  ;;  %v1880_v27 = vld [vmem:[%s2413_s1 + $0x250] sm:$0xff]   ;;  %v1895_v46 = vld [vmem:[%s2413_s1 + $0x2a8] sm:$0xff]  }
  0x1e   :  { %1665 = vmatprep.subr.bf16.mxu1 %v1836_v30  ;;  %v1881_v29 = vld [vmem:[%s2413_s1 + $0x2d0] sm:$0xff]  }
  0x1f   :  { %v1882_v30 = vld [vmem:[%s2413_s1 + $0x210] sm:$0xff]  }
  0x20   :  { %1644 = vmatpush3.bf16.msra.mxu0 %v1837_v31  ;;  %v1884_v31 = vld [vmem:[%s2413_s1 + $0x258] sm:$0xff]  }
  0x21   :  { %1666 = vmatpush3.bf16.msra.mxu1 %v1838_v32  ;;  %1673 = vmatprep.subr.bf16.mxu0 %v1840_v35  ;;  %v1883_v32 = vld [vmem:[%s2413_s1 + $0x290] sm:$0xff]   ;;  %v1888_v35 = vld [vmem:[%s2413_s1 + $0x260] sm:$0xff]  }
  0x22   :  { %1695 = vmatprep.subr.bf16.mxu1 %v1841_v38  ;;  %v1890_v38 = vld [vmem:[%s2413_s1 + $0x220] sm:$0xff]  }
  0x23   :  { %1198 = vmatmul.mubr.bf16.vlgmr.msra.gmra.mrb[0].mxu0 %v306_v45  ;;  %v17_v45 = vld [vmem:[%s2412_s0 + $0x8] sm:$0xff] }
  0x24   :  { %1674 = vmatpush3.bf16.msra.mxu0 %v1842_v48  ;;  %1238 = vmatmul.mubr.bf16.vlgmr.msra.gmra.mrb[0].mxu1 %v328_v50  ;;  %v339_v47 = vrot.slane %v17_v45, %v2088_v41  ;;  %v332_v48 = vcombine.high %v17_v45, %v17_v45  ;;  %v1898_v50 = vld [vmem:[%s2413_s1 + $0x230] sm:$0xff]  }
  0x25   :  { %1675 = vmatprep.subr.bf16.mxu0 %v1844_v51  ;;  %1696 = vmatpush3.bf16.msra.mxu1 %v1843_v53  ;;  %v1900_v53 = vld [vmem:[%s2413_s1 + $0x278] sm:$0xff]  }
  0x26   :  { %1277 = vmatprep.mubr.bf16.mxu0 %v327_v49  ;;  %1697 = vmatprep.subr.bf16.mxu1 %v1845_v54  ;;  %v1897_v49 = vld [vmem:[%s2413_s1 + $0x2f0] sm:$0xff]   ;;  %v347_v51 = vcombine.high %v339_v47, %v339_v47  ;;  %v2277_v52 = vrot.slane %v332_v48, %v2088_v41 }
  0x27   :  { %1317 = vmatprep.mubr.bf16.mxu1 %v331_v55  ;;  %v1899_v54 = vld [vmem:[%s2413_s1 + $0x2b0] sm:$0xff]  }
  0x28   :  { %1676 = vmatpush3.bf16.msra.mxu0 %v1846_v56  ;;  %v369_v55 = vrot.slane %v347_v51, %v2088_v41  ;;  %v348_v56 = vcombine.high %v2277_v52, %v2277_v52 }
  0x29   :  { %1677 = vmatprep.subr.bf16.mxu0 %v1848_v57  ;;  %1698 = vmatpush3.bf16.msra.mxu1 %v1847_v58  ;;  %v1901_v57 = vld [vmem:[%s2413_s1 + $0x2f8] sm:$0xff]  }
  0x2a   :  { %1699 = vmatprep.subr.bf16.mxu1 %v1849_v59  ;;  %v1902_v58 = vld [vmem:[%s2413_s1 + $0x238] sm:$0xff]   ;;  %v379_v59 = vcombine.high %v369_v55, %v369_v55 }
  0x2c   :  { %1678 = vmatpush3.bf16.msra.mxu0 %v1850_v60  ;;  %v355_v60 = vrot.slane %v339_v47, %v2088_v41 }
  0x2d   :  { %1679 = vmatprep.subr.bf16.mxu0 %v1852_v61  ;;  %1700 = vmatpush3.bf16.msra.mxu1 %v1851_v62  ;;  %v1904_v61 = vld [vmem:[%s2413_s1 + $0x340] sm:$0xff]   ;;  %v1903_v62 = vld [vmem:[%s2413_s1 + $0x2b8] sm:$0xff]  }
  0x2e   :  { %1701 = vmatprep.subr.bf16.mxu1 %v1853_v63  ;;  %v376_v63 = vrot.slane %v348_v56, %v2088_v41 }
  0x30   :  { %1680 = vmatpush3.bf16.msra.mxu0 %v1854_v0  ;;  %v1905_v0 = vld [vmem:[%s2413_s1 + $0x3c0] sm:$0xff]  }
  0x31   :  { %1681 = vmatprep.subr.bf16.mxu0 %v1856_v1  ;;  %1702 = vmatpush3.bf16.msra.mxu1 %v1855_v2  ;;  %v1906_v1 = vld [vmem:[%s2413_s1 + $0x300] sm:$0xff]   ;;  %v377_v2 = vcombine.high %v355_v60, %v355_v60 }
  0x32   :  { %1703 = vmatprep.subr.bf16.mxu1 %v1857_v3  ;;  %v1908_v3 = vld [vmem:[%s2413_s1 + $0x348] sm:$0xff]  }
  0x34   :  { %1682 = vmatpush3.bf16.msra.mxu0 %v1858_v4  ;;  %v1907_v4 = vld [vmem:[%s2413_s1 + $0x380] sm:$0xff]  }
  0x35   :  { %1683 = vmatprep.subr.bf16.mxu0 %v1860_v5  ;;  %1704 = vmatpush3.bf16.msra.mxu1 %v1859_v6  ;;  %v380_v5 = vcombine.high %v376_v63, %v376_v63  ;;  %v1909_v6 = vld [vmem:[%s2413_s1 + $0x3c8] sm:$0xff]  }
  0x36   :  { %1705 = vmatprep.subr.bf16.mxu1 %v1861_v7  ;;  %v1910_v7 = vld [vmem:[%s2413_s1 + $0x308] sm:$0xff]  }
  0x38   :  { %1684 = vmatpush3.bf16.msra.mxu0 %v1862_v8  ;;  %v1912_v8 = vld [vmem:[%s2413_s1 + $0x350] sm:$0xff]  }
  0x39   :  { %1685 = vmatprep.subr.bf16.mxu0 %v1864_v9  ;;  %1706 = vmatpush3.bf16.msra.mxu1 %v1863_v10  ;;  %v1911_v9 = vld [vmem:[%s2413_s1 + $0x388] sm:$0xff]   ;;  %v1913_v10 = vld [vmem:[%s2413_s1 + $0x3d0] sm:$0xff]  }
  0x3a   :  { %1707 = vmatprep.subr.bf16.mxu1 %v1865_v11  ;;  %v1914_v11 = vld [vmem:[%s2413_s1 + $0x310] sm:$0xff]  }
  0x3c   :  { %1686 = vmatpush3.bf16.msra.mxu0 %v1866_v12  ;;  %v1916_v12 = vld [vmem:[%s2413_s1 + $0x358] sm:$0xff]  }
  0x3d   :  { %1687 = vmatprep.subr.bf16.mxu0 %v1868_v13  ;;  %1708 = vmatpush3.bf16.msra.mxu1 %v1867_v14  ;;  %v1915_v13 = vld [vmem:[%s2413_s1 + $0x390] sm:$0xff]   ;;  %v1917_v14 = vld [vmem:[%s2413_s1 + $0x3d8] sm:$0xff]  }
  0x3e   :  { %1709 = vmatprep.subr.bf16.mxu1 %v1869_v15  ;;  %v1918_v15 = vld [vmem:[%s2413_s1 + $0x318] sm:$0xff]  }
  0x40   :  { %1688 = vmatpush3.bf16.msra.mxu0 %v1870_v16  ;;  %v1920_v16 = vld [vmem:[%s2413_s1 + $0x360] sm:$0xff]  }
  0x41   :  { %1717 = vmatprep.subr.bf16.mxu0 %v1872_v18  ;;  %1710 = vmatpush3.bf16.msra.mxu1 %v1871_v19  ;;  %v1921_v18 = vld [vmem:[%s2413_s1 + $0x3e0] sm:$0xff]  }
  0x42   :  { %1739 = vmatprep.subr.bf16.mxu1 %v1873_v20  ;;  %v1922_v19 = vld [vmem:[%s2413_s1 + $0x320] sm:$0xff]   ;;  %v1924_v20 = vld [vmem:[%s2413_s1 + $0x368] sm:$0xff]  }
  0x43   :  { %1278 = vmatmul.mubr.bf16.vlgmr.msra.gmra.mrb[4].mxu0 %v313_v17  ;;  %v1919_v17 = vld [vmem:[%s2413_s1 + $0x398] sm:$0xff]  }
  0x44   :  { %1718 = vmatpush3.bf16.msra.mxu0 %v1874_v21  ;;  %1318 = vmatmul.mubr.bf16.vlgmr.msra.gmra.mrb[4].mxu1 %v329_v22  ;;  %v1923_v21 = vld [vmem:[%s2413_s1 + $0x3a0] sm:$0xff]   ;;  %v1925_v22 = vld [vmem:[%s2413_s1 + $0x3e8] sm:$0xff]  }
  0x45   :  { %1719 = vmatprep.subr.bf16.mxu0 %v1876_v23  ;;  %1740 = vmatpush3.bf16.msra.mxu1 %v1875_v24  ;;  %v1926_v23 = vld [vmem:[%s2413_s1 + $0x328] sm:$0xff]   ;;  %v1928_v24 = vld [vmem:[%s2413_s1 + $0x370] sm:$0xff]  }
  0x46   :  { %1741 = vmatprep.subr.bf16.mxu1 %v1877_v25  ;;  %1357 = vmatprep.mubr.bf16.mxu0 %v369_v55 }
  0x47   :  { %1397 = vmatprep.mubr.bf16.mxu1 %v379_v59 }
  0x48   :  { %1720 = vmatpush3.bf16.msra.mxu0 %v1878_v26 }
  0x49   :  { %1721 = vmatprep.subr.bf16.mxu0 %v1880_v27  ;;  %1742 = vmatpush3.bf16.msra.mxu1 %v1879_v28 }
  0x4a   :  { %1743 = vmatprep.subr.bf16.mxu1 %v1881_v29 }
  0x4c   :  { %1722 = vmatpush3.bf16.msra.mxu0 %v1882_v30 }
  0x4d   :  { %1723 = vmatprep.subr.bf16.mxu0 %v1884_v31  ;;  %1744 = vmatpush3.bf16.msra.mxu1 %v1883_v32 }
  0x4e   :  { %1745 = vmatprep.subr.bf16.mxu1 %v1885_v33 }
  0x50   :  { %1724 = vmatpush3.bf16.msra.mxu0 %v1886_v34 }
  0x51   :  { %1725 = vmatprep.subr.bf16.mxu0 %v1888_v35  ;;  %1746 = vmatpush3.bf16.msra.mxu1 %v1887_v36 }
  0x52   :  { %1747 = vmatprep.subr.bf16.mxu1 %v1889_v37 }
  0x54   :  { %1726 = vmatpush3.bf16.msra.mxu0 %v1890_v38 }
  0x55   :  { %1727 = vmatprep.subr.bf16.mxu0 %v1892_v39  ;;  %1748 = vmatpush3.bf16.msra.mxu1 %v1891_v40 }
  0x56   :  { %1749 = vmatprep.subr.bf16.mxu1 %v1893_v42 }
  0x58   :  { %1728 = vmatpush3.bf16.msra.mxu0 %v1894_v43 }
  0x59   :  { %1729 = vmatprep.subr.bf16.mxu0 %v1896_v44  ;;  %1750 = vmatpush3.bf16.msra.mxu1 %v1895_v46 }
  0x5a   :  { %1751 = vmatprep.subr.bf16.mxu1 %v1897_v49 }
  0x5c   :  { %1730 = vmatpush3.bf16.msra.mxu0 %v1898_v50 }
  0x5d   :  { %1731 = vmatprep.subr.bf16.mxu0 %v1900_v53  ;;  %1752 = vmatpush3.bf16.msra.mxu1 %v1899_v54 }
  0x5e   :  { %1753 = vmatprep.subr.bf16.mxu1 %v1901_v57 }
  0x60   :  { %1732 = vmatpush3.bf16.msra.mxu0 %v1902_v58 }
  0x61   :  { %1761 = vmatprep.subr.bf16.mxu0 %v1904_v61  ;;  %1754 = vmatpush3.bf16.msra.mxu1 %v1903_v62 }
  0x62   :  { %1783 = vmatprep.subr.bf16.mxu1 %v1905_v0 }
  0x63   :  { %1358 = vmatmul.mubr.bf16.vlgmr.msra.gmra.mrb[8].mxu0 %v355_v60 }
  0x64   :  { %1762 = vmatpush3.bf16.msra.mxu0 %v1906_v1  ;;  %1437 = vmatprep.mubr.bf16.mxu0 %v376_v63 }
  0x65   :  { %1398 = vmatmul.mubr.bf16.vlgmr.msra.gmra.mrb[8].mxu1 %v377_v2  ;;  %1763 = vmatprep.subr.bf16.mxu0 %v1908_v3 }
  0x66   :  { %1784 = vmatpush3.bf16.msra.mxu1 %v1907_v4  ;;  %1477 = vmatprep.mubr.bf16.mxu1 %v380_v5 }
  0x67   :  { %1785 = vmatprep.subr.bf16.mxu1 %v1909_v6 }
  0x68   :  { %1764 = vmatpush3.bf16.msra.mxu0 %v1910_v7 }
  0x69   :  { %1765 = vmatprep.subr.bf16.mxu0 %v1912_v8 }
  0x6a   :  { %1786 = vmatpush3.bf16.msra.mxu1 %v1911_v9 }
  0x6b   :  { %1787 = vmatprep.subr.bf16.mxu1 %v1913_v10 }
  0x6c   :  { %1766 = vmatpush3.bf16.msra.mxu0 %v1914_v11 }
  0x6d   :  { %1767 = vmatprep.subr.bf16.mxu0 %v1916_v12 }
  0x6e   :  { %1788 = vmatpush3.bf16.msra.mxu1 %v1915_v13 }
  0x6f   :  { %1789 = vmatprep.subr.bf16.mxu1 %v1917_v14 }
  0x70   :  { %1768 = vmatpush3.bf16.msra.mxu0 %v1918_v15 }
  0x71   :  { %1769 = vmatprep.subr.bf16.mxu0 %v1920_v16 }
  0x72   :  { %1790 = vmatpush3.bf16.msra.mxu1 %v1919_v17 }
  0x73   :  { %1791 = vmatprep.subr.bf16.mxu1 %v1921_v18 }
  0x74   :  { %1770 = vmatpush3.bf16.msra.mxu0 %v1922_v19 }
  0x75   :  { %1771 = vmatprep.subr.bf16.mxu0 %v1924_v20 }
  0x76   :  { %8 = vsyncpa [#allocation3], 0  ;;  %1792 = vmatpush3.bf16.msra.mxu1 %v1923_v21  ;;  %v1927_v25 = vld [vmem:[%s2413_s1 + $0x3a8] sm:$0xff]   ;;  %v1929_v26 = vld [vmem:[%s2413_s1 + $0x3f0] sm:$0xff]   ;;  %v362_v32 = vrot.slane %v2277_v52, %v2088_v41 }
  0x77   :  { %1793 = vmatprep.subr.bf16.mxu1 %v1925_v22  ;;  %v1930_v27 = vld [vmem:[%s2413_s1 + $0x330] sm:$0xff]   ;;  %v1932_v28 = vld [vmem:[%s2413_s1 + $0x378] sm:$0xff]   ;;  %v1500_v36 = vld [vmem:[%s2414_s2] ss:$0 sm:$0xff] }
  0x78   :  { %1772 = vmatpush3.bf16.msra.mxu0 %v1926_v23  ;;  %v1931_v29 = vld [vmem:[%s2413_s1 + $0x3b0] sm:$0xff]   ;;  %v1933_v30 = vld [vmem:[%s2413_s1 + $0x3f8] sm:$0xff]   ;;  %v378_v34 = vcombine.high %v362_v32, %v362_v32 }
  0x79   :  { %1773 = vmatprep.subr.bf16.mxu0 %v1928_v24  ;;  %v1934_v31 = vld [vmem:[%s2413_s1 + $0x338] sm:$0xff]  }
  0x7a   :  { %1794 = vmatpush3.bf16.msra.mxu1 %v1927_v25  ;;  %v1935_v33 = vld [vmem:[%s2413_s1 + $0x3b8] sm:$0xff]   ;;  %s1962_s1 = smov [#allocation2]  }
  0x7b   :  { %1795 = vmatprep.subr.bf16.mxu1 %v1929_v26  ;;  %s1492_s2 = sshll.u32 %s1962_s1, 4  ;;  %s1493_s2 = int_to_ptr.vmem [resolvable:$true] %s1492_s2 }
  0x7c   :  { %1774 = vmatpush3.bf16.msra.mxu0 %v1930_v27  ;;  %s1937_s28 = scalar_lea.vmem %s1493_s2, 32  ;;  %p1942_p1 = scmp.lt.s32.totalorder %s1493_s2, %s1493_s2 }
  0x7d   :  { %1775 = vmatprep.subr.bf16.mxu0 %v1932_v28  ;;  %p1938_p0 = scmp.ne.s32.totalorder %s1493_s2, %s1937_s28  ;;  %p1943_p2 = scmp.lt.s32.totalorder %s1937_s28, %s1937_s28 }
  0x7e   :  { %1796 = vmatpush3.bf16.msra.mxu1 %v1931_v29 }
  0x7f   :  { %1797 = vmatprep.subr.bf16.mxu1 %v1933_v30  ;;  %p1944_p3 = por %p1943_p2, %p1942_p1 }
  0x80   :  { %1776 = vmatpush3.bf16.msra.mxu0 %v1934_v31 }
  0x81   :  { %p1945_p4 = pnand %p1944_p3, %p1938_p0 }
  0x82   :  { %1798 = vmatpush3.bf16.msra.mxu1 %v1935_v33 }
  0x83   :  { %1438 = vmatmul.mubr.bf16.vlgmr.msra.gmra.mrb[12].mxu0 %v362_v32 }
  0x85   :  { %1478 = vmatmul.mubr.bf16.vlgmr.msra.gmra.mrb[12].mxu1 %v378_v34 }
  0xf6   :  { %v1645_v35 = vpop.f32.mrb[0].mxu0 }
  0xf7   :  { %v1646_v37 = vpop.f32.mrb[1].mxu0  ;;  %v1667_v38 = vpop.f32.mrb[0].mxu1 }
  0xf8   :  { %v1647_v39 = vadd.f32 %v1646_v37, %v1645_v35  ;;  %v1648_v41 = vpop.f32.mrb[2].mxu0  ;;  %v1668_v40 = vpop.f32.mrb[1].mxu1 }
  0xf9   :  { %v1649_v42 = vpop.f32.mrb[3].mxu0  ;;  %v1669_v44 = vadd.f32 %v1668_v40, %v1667_v38  ;;  %v1670_v45 = vpop.f32.mrb[2].mxu1 }
  0xfa   :  { %v1200_v43 = vadd.f32 %v1647_v39, %v1500_v36  ;;  %v1671_v46 = vpop.f32.mrb[3].mxu1 }
  0xfc   :  { %v1240_v47 = vadd.f32 %v1669_v44, %v1200_v43 }
 0x116   :  { %v1689_v48 = vpop.f32.mrb[4].mxu0 }
 0x117   :  { %v1690_v49 = vpop.f32.mrb[5].mxu0  ;;  %v1711_v50 = vpop.f32.mrb[4].mxu1 }
 0x118   :  { %v1691_v51 = vadd.f32 %v1690_v49, %v1689_v48  ;;  %v1692_v52 = vpop.f32.mrb[6].mxu0  ;;  %v1712_v53 = vpop.f32.mrb[5].mxu1 }
 0x119   :  { %v1693_v54 = vpop.f32.mrb[7].mxu0  ;;  %v1713_v56 = vadd.f32 %v1712_v53, %v1711_v50  ;;  %v1714_v57 = vpop.f32.mrb[6].mxu1 }
 0x11a   :  { %v1280_v55 = vadd.f32 %v1691_v51, %v1240_v47  ;;  %v1715_v58 = vpop.f32.mrb[7].mxu1 }
 0x11c   :  { %v1320_v59 = vadd.f32 %v1713_v56, %v1280_v55 }
 0x136   :  { %v1733_v60 = vpop.f32.mrb[8].mxu0 }
 0x137   :  { %v1734_v61 = vpop.f32.mrb[9].mxu0 }
 0x138   :  { %v1755_v62 = vpop.f32.mrb[8].mxu1  ;;  %v1735_v63 = vadd.f32 %v1734_v61, %v1733_v60  ;;  %v1736_v0 = vpop.f32.mrb[10].mxu0 }
 0x139   :  { %v1756_v1 = vpop.f32.mrb[9].mxu1  ;;  %v1737_v2 = vpop.f32.mrb[11].mxu0 }
 0x13a   :  { %v1360_v3 = vadd.f32 %v1735_v63, %v1320_v59  ;;  %v1757_v4 = vadd.f32 %v1756_v1, %v1755_v62  ;;  %v1758_v5 = vpop.f32.mrb[10].mxu1 }
 0x13b   :  { %v1759_v6 = vpop.f32.mrb[11].mxu1 }
 0x13c   :  { %v1400_v7 = vadd.f32 %v1757_v4, %v1360_v3 }
 0x156   :  { %v1777_v8 = vpop.f32.mrb[12].mxu0 }
 0x157   :  { %v1778_v9 = vpop.f32.mrb[13].mxu0 }
 0x158   :  { %v1799_v10 = vpop.f32.mrb[12].mxu1  ;;  %v1779_v11 = vadd.f32 %v1778_v9, %v1777_v8  ;;  %v1780_v12 = vpop.f32.mrb[14].mxu0 }
 0x159   :  { %v1800_v13 = vpop.f32.mrb[13].mxu1  ;;  %v1781_v14 = vpop.f32.mrb[15].mxu0 }
 0x15a   :  { %v1440_v15 = vadd.f32 %v1779_v11, %v1400_v7  ;;  %v1801_v16 = vadd.f32 %v1800_v13, %v1799_v10  ;;  %v1802_v17 = vpop.f32.mrb[14].mxu1 }
 0x15b   :  { %v1803_v18 = vpop.f32.mrb[15].mxu1 }
 0x15c   :  { %v1480_v19 = vadd.f32 %v1801_v16, %v1440_v15 }
 0x15e   :  { %1485 = vst [vmem:[#allocation2] sm:$0x3] %v1480_v19 }
 0x15f   :  { %1948 = shalt.err (!%p1945_p4)
}
 0x160   :  { %s1949_s4 = scalar_lea.hbm %s2415_s3, 32 }
 0x161   :  { %p1950_p5 = scmp.ne.s32.totalorder %s2415_s3, %s1949_s4  ;;  %p1953_p6 = scmp.lt.u32.totalorder %s1949_s4, %s2415_s3 }
 0x163   :  { %p1955_p7 = pnand %p1953_p6, %p1950_p5 }
 0x165   :  { %1958 = shalt.err (!%p1955_p7)
}
 0x166   :  { %1495 = dma.vmem_to_hbm [thread:$0]  %s1493_s2, 32, %s2415_s3, [#allocation3]  }
 0x167   :  { %1959 = dma.done.wait [#allocation3], 32  }
 0x168   :  { %1960 = vsyncadd [#allocation3], 4294967264 }
 0x169   :  { %1499 = vsyncpa [#allocation3], 1 }

// kernel: cnn_forward.2
= control target key start
LH: loop header
LB: loop body
LE: loop exit
PB: predicated region body
PF: predicated region fallthrough
CT: control target
= control target key end

     0   :  { %s4578_s12 = smov 0   ;;  %s5513_s0 = inlined_call_operand.vmem [shape: f32[2,4,9,9,8], index: 0, kind: input, shape index: {}]   ;;  %s5514_s1 = inlined_call_operand.vmem [shape: f32[9,8,32], index: 1, kind: input, shape index: {}]   ;;  %s5515_s2 = inlined_call_operand.vmem [shape: f32[1,32], index: 2, kind: input, shape index: {}]   ;;  %s5516_s3 = inlined_call_operand.vmem [shape: bf16[2,64,32], index: 3, kind: output, shape index: {}]  }
   0x1 LB: > { %s3100_s13 = sadd.s32 4294967295, %s4556_s12   ;;  %p3104_p0 = scmp.ge.s32.totalorder %s4556_s12, 1  ;;  %s4556_s12 = sphi %s4578_s12, %s13_s12  }
   0x2   : > { %p137_p1 = scmp.lt.s32.totalorder %s4556_s12, 3 }
   0x4   : > { %p138_p2 = pnand %p3104_p0, %p137_p1 }
   0x6   : > { %141 = sbr.rel (%p138_p2) target bundleno = 532 (0x214), region = 32 }
   0xd   : > { %v3140_v0 = vld [vmem:[%s5514_s1 + $0x8] sm:$0xff]  ;;  %v4592_v1 = vld [vmem:[%s5514_s1 + $0x20] sm:$0xff]  ;;  %p161_p3 = scmp.lt.s32.totalorder %s3100_s13, 1  ;;  %vm225_vm0 = vcmask 64512   ;;  %v4639_v10 = vld [vmem:[%s5514_s1 + $0x30] sm:$0xff]  ;;  %vm3036_vm1 = vcmask 257024  }
   0xe   : > { %v206_v2 = vld [vmem:[%s5514_s1] sm:$0xff]  ;;  %3833 = vmatprep.subr.mxu1 %v3140_v0  ;;  %4033 = vmatprep.subr.mxu0 %v4592_v1  ;;  %v3352_v3 = vld [vmem:[%s5514_s1 + $0x28] sm:$0xff]  ;;  %v4644_v11 = vld [vmem:[%s5514_s1 + $0x10] sm:$0xff] }
   0xf   : > { %3834 = vmatpush3.msra.mxu1 %v3140_v0  ;;  %4034 = vmatpush3.msra.mxu0 %v4592_v1  ;;  %s5530_s13 = smov (!%p161_p3, %s3100_s13), 1  ;;  %v4789_v38 = vld [vmem:[%s5514_s1 + $0x38] sm:$0xff] }
  0x10   : > { %3883 = vmatprep.subr.mxu1 %v206_v2  ;;  %4083 = vmatprep.subr.mxu0 %v3352_v3  ;;  %s4541_s22 = smul.u32 576, %s5530_s13  ;;  %v4890_v50 = vld [vmem:[%s5514_s1 + $0x18] sm:$0xff]  ;;  %s3527_s11 = sshll.u32 %s5530_s13, 5 }
  0x11   : > { %s5475_s16 = scalar_lea.vmem %s5516_s3, %s3527_s11 }
  0x12   : > { %s4608_s25 = scalar_lea.vmem %s5513_s0, %s4541_s22 }
  0x13   : > { %v4611_v4 = vld [vmem:[%s4608_s25 + $0x90] sm:$0xff]  ;;  %v4617_v6 = vld [vmem:[%s4608_s25 + $0xa0] sm:$0xff] }
  0x14   : > { %v4614_v5 = vld [vmem:[%s4608_s25 + $0x1b0] sm:$0xff]  ;;  %3835 = vmatprep.mubr.msk.f32.mxu1 %vm225_vm0, %v4611_v4  ;;  %v4624_v7 = vld [vmem:[%s4608_s25 + $0x1c0] sm:$0xff] }
  0x15   : > { %4035 = vmatprep.mubr.msk.f32.mxu0 %vm225_vm0, %v4614_v5  ;;  %v4627_v8 = vld [vmem:[%s4608_s25 + $0xb0] sm:$0xff]  ;;  %3836 = vmatmul.mubr.msk.f32.vlgmr.msra.gmra.mrb[0].mxu1 %vm225_vm0, %v4617_v6  ;;  %v4647_v12 = vld [vmem:[%s4608_s25 + $0xc0] sm:$0xff] }
  0x16   : > { %v4630_v9 = vld [vmem:[%s4608_s25 + $0x1d0] sm:$0xff]  ;;  %4036 = vmatmul.mubr.msk.f32.vlgmr.msra.gmra.mrb[0].mxu0 %vm225_vm0, %v4624_v7  ;;  %3884 = vmatpush3.msra.mxu1 %v206_v2  ;;  %v4650_v13 = vld [vmem:[%s4608_s25 + $0x1e0] sm:$0xff] }
  0x17   : > { %4084 = vmatpush3.msra.mxu0 %v3352_v3  ;;  %3838 = vmatprep.mubr.msk.f32.mxu1 %vm225_vm0, %v4627_v8  ;;  %v4657_v14 = vld [vmem:[%s4608_s25 + $0xd0] sm:$0xff]  ;;  %v4673_v16 = vld [vmem:[%s4608_s25 + $0xe0] sm:$0xff] }
  0x18   : > { %4038 = vmatprep.mubr.msk.f32.mxu0 %vm225_vm0, %v4630_v9  ;;  %v4660_v15 = vld [vmem:[%s4608_s25 + $0x1f0] sm:$0xff]  ;;  %4133 = vmatprep.subr.mxu0 %v4639_v10  ;;  %v4676_v17 = vld [vmem:[%s4608_s25 + $0x200] sm:$0xff] }
  0x19   : > { %3933 = vmatprep.subr.mxu1 %v4644_v11  ;;  %3839 = vmatmul.mubr.msk.f32.gmra.mrb[2].mxu1 %vm225_vm0, %v4647_v12  ;;  %v4679_v18 = vld [vmem:[%s4608_s25 + $0xf0] sm:$0xff]  ;;  %v4693_v20 = vld [vmem:[%s4608_s25 + $0x100] sm:$0xff] }
  0x1a   : > { %4039 = vmatmul.mubr.msk.f32.gmra.mrb[2].mxu0 %vm225_vm0, %v4650_v13  ;;  %3841 = vmatprep.mubr.msk.f32.mxu1 %vm225_vm0, %v4657_v14  ;;  %v4682_v19 = vld [vmem:[%s4608_s25 + $0x210] sm:$0xff]  ;;  %v4696_v21 = vld [vmem:[%s4608_s25 + $0x220] sm:$0xff] }
  0x1b   : > { %4041 = vmatprep.mubr.msk.f32.mxu0 %vm225_vm0, %v4660_v15  ;;  %v4699_v22 = vld [vmem:[%s4608_s25 + $0x1] sm:$0xff]  ;;  %v4713_v24 = vld [vmem:[%s4608_s25 + $0x11] sm:$0xff] }
  0x1c   : > { %v4702_v23 = vld [vmem:[%s4608_s25 + $0x121] sm:$0xff]  ;;  %v4716_v25 = vld [vmem:[%s4608_s25 + $0x131] sm:$0xff] }
  0x1d   : > { %3842 = vmatmul.mubr.msk.f32.gmra.mrb[4].mxu1 %vm225_vm0, %v4673_v16  ;;  %v4719_v26 = vld [vmem:[%s4608_s25 + $0x21] sm:$0xff]  ;;  %v4733_v28 = vld [vmem:[%s4608_s25 + $0x31] sm:$0xff] }
  0x1e   : > { %4042 = vmatmul.mubr.msk.f32.gmra.mrb[4].mxu0 %vm225_vm0, %v4676_v17  ;;  %3844 = vmatprep.mubr.msk.f32.mxu1 %vm225_vm0, %v4679_v18  ;;  %v4722_v27 = vld [vmem:[%s4608_s25 + $0x141] sm:$0xff]  ;;  %v4736_v29 = vld [vmem:[%s4608_s25 + $0x151] sm:$0xff] }
  0x1f   : > { %4044 = vmatprep.mubr.msk.f32.mxu0 %vm225_vm0, %v4682_v19  ;;  %v4739_v30 = vld [vmem:[%s4608_s25 + $0x41] sm:$0xff]  ;;  %v4753_v32 = vld [vmem:[%s4608_s25 + $0x51] sm:$0xff] }
  0x20   : > { %v4742_v31 = vld [vmem:[%s4608_s25 + $0x161] sm:$0xff]  ;;  %v4756_v33 = vld [vmem:[%s4608_s25 + $0x171] sm:$0xff] }
  0x21   : > { %3845 = vmatmul.mubr.msk.f32.gmra.mrb[6].mxu1 %vm225_vm0, %v4693_v20  ;;  %v4759_v34 = vld [vmem:[%s4608_s25 + $0x61] sm:$0xff]  ;;  %v4773_v36 = vld [vmem:[%s4608_s25 + $0x71] sm:$0xff] }
  0x22   : > { %4045 = vmatmul.mubr.msk.f32.gmra.mrb[6].mxu0 %vm225_vm0, %v4696_v21  ;;  %3847 = vmatprep.mubr.msk.f32.mxu1 %vm225_vm0, %v4699_v22  ;;  %v4762_v35 = vld [vmem:[%s4608_s25 + $0x181] sm:$0xff]  ;;  %v4776_v37 = vld [vmem:[%s4608_s25 + $0x191] sm:$0xff] }
  0x23   : > { %4047 = vmatprep.mubr.msk.f32.mxu0 %vm225_vm0, %v4702_v23  ;;  %v4818_v39 = vld [vmem:[%s4608_s25 + $0x1b1] sm:$0xff]  ;;  %v4829_v40 = vld [vmem:[%s4608_s25 + $0x1c1] sm:$0xff] }
  0x24   : > { %v4832_v41 = vld [vmem:[%s4608_s25 + $0x1d1] sm:$0xff]  ;;  %v4843_v42 = vld [vmem:[%s4608_s25 + $0x1e1] sm:$0xff] }
  0x25   : > { %3848 = vmatmul.mubr.msk.f32.gmra.mrb[8].mxu1 %vm225_vm0, %v4713_v24  ;;  %v4846_v43 = vld [vmem:[%s4608_s25 + $0x1f1] sm:$0xff]  ;;  %v4857_v44 = vld [vmem:[%s4608_s25 + $0x201] sm:$0xff] }
  0x26   : > { %4048 = vmatmul.mubr.msk.f32.gmra.mrb[8].mxu0 %vm225_vm0, %v4716_v25  ;;  %3850 = vmatprep.mubr.msk.f32.mxu1 %vm225_vm0, %v4719_v26  ;;  %v4860_v45 = vld [vmem:[%s4608_s25 + $0x211] sm:$0xff]  ;;  %v4871_v46 = vld [vmem:[%s4608_s25 + $0x221] sm:$0xff] }
  0x27   : > { %4050 = vmatprep.mubr.msk.f32.mxu0 %vm225_vm0, %v4722_v27  ;;  %v171_v47 = vld [vmem:[%s4608_s25] sm:$0xff]  ;;  %v4882_v48 = vld [vmem:[%s4608_s25 + $0x10] sm:$0xff] }
  0x28   : > { %v4885_v49 = vld [vmem:[%s4608_s25 + $0x20] sm:$0xff]  ;;  %v4900_v51 = vld [vmem:[%s4608_s25 + $0x30] sm:$0xff] }
  0x29   : > { %3851 = vmatmul.mubr.msk.f32.gmra.mrb[10].mxu1 %vm225_vm0, %v4733_v28  ;;  %5521 = vst [vmem:[#allocation2_spill] sm:$0xff] %v4900_v51  ;;  %v4905_v52 = vld [vmem:[%s4608_s25 + $0x40] sm:$0xff]  ;;  %v4917_v53 = vld [vmem:[%s4608_s25 + $0x50] sm:$0xff] }
  0x2a   : > { %4051 = vmatmul.mubr.msk.f32.gmra.mrb[10].mxu0 %vm225_vm0, %v4736_v29  ;;  %3853 = vmatprep.mubr.msk.f32.mxu1 %vm225_vm0, %v4739_v30  ;;  %5522 = vst [vmem:[#allocation3_spill] sm:$0xff] %v4905_v52  ;;  %v4920_v54 = vld [vmem:[%s4608_s25 + $0x60] sm:$0xff]  ;;  %v4931_v55 = vld [vmem:[%s4608_s25 + $0x70] sm:$0xff] }
  0x2b   : > { %4053 = vmatprep.mubr.msk.f32.mxu0 %vm225_vm0, %v4742_v31  ;;  %v4934_v56 = vld [vmem:[%s4608_s25 + $0x81] sm:$0xff]  ;;  %v4948_v58 = vld [vmem:[%s4608_s25 + $0xb1] sm:$0xff] }
  0x2c   : > { %v4937_v57 = vld [vmem:[%s4608_s25 + $0xa1] sm:$0xff]  ;;  %v4962_v60 = vld [vmem:[%s4608_s25 + $0xd1] sm:$0xff] }
  0x2d   : > { %3854 = vmatmul.mubr.msk.f32.gmra.mrb[12].mxu1 %vm225_vm0, %v4753_v32  ;;  %v4951_v59 = vld [vmem:[%s4608_s25 + $0xc1] sm:$0xff]  ;;  %v4976_v62 = vld [vmem:[%s4608_s25 + $0xf1] sm:$0xff] }
  0x2e   : > { %4054 = vmatmul.mubr.msk.f32.gmra.mrb[12].mxu0 %vm225_vm0, %v4756_v33  ;;  %3856 = vmatprep.mubr.msk.f32.mxu1 %vm225_vm0, %v4759_v34  ;;  %v4965_v61 = vld [vmem:[%s4608_s25 + $0xe1] sm:$0xff]  ;;  %v4990_v0 = vld [vmem:[%s4608_s25 + $0x111] sm:$0xff] }
  0x2f   : > { %4056 = vmatprep.mubr.msk.f32.mxu0 %vm225_vm0, %v4762_v35  ;;  %v4979_v63 = vld [vmem:[%s4608_s25 + $0x101] sm:$0xff]  ;;  %5523 = vst [vmem:[#allocation4_spill] sm:$0xff] %v4990_v0  ;;  %v5004_v3 = vld [vmem:[%s4608_s25 + $0x130] sm:$0xff] }
  0x30   : > { %v4993_v2 = vld [vmem:[%s4608_s25 + $0x120] sm:$0xff] }
  0x31   : > { %3857 = vmatmul.mubr.msk.f32.gmra.mrb[14].mxu1 %vm225_vm0, %v4773_v36 }
  0x32   : > { %4057 = vmatmul.mubr.msk.f32.gmra.mrb[14].mxu0 %vm225_vm0, %v4776_v37  ;;  %3859 = vmatprep.mubr.msk.f32.mxu1 %vm225_vm0, %v4614_v5 }
  0x33   : > { %4085 = vmatprep.mubr.msk.f32.mxu0 %vm225_vm0, %v4702_v23 }
  0x35   : > { %3860 = vmatmul.mubr.msk.f32.gmra.mrb[16].mxu1 %vm225_vm0, %v4624_v7 }
  0x36   : > { %4086 = vmatmul.mubr.msk.f32.vlgmr.msra.gmra.mrb[0].mxu0 %vm225_vm0, %v4716_v25  ;;  %3862 = vmatprep.mubr.msk.f32.mxu1 %vm225_vm0, %v4630_v9 }
  0x37   : > { %4134 = vmatpush3.msra.mxu0 %v4639_v10  ;;  %4088 = vmatprep.mubr.msk.f32.mxu0 %vm225_vm0, %v4722_v27  ;;  %v5012_v10 = vld [vmem:[%s5514_s1 + $0x40] sm:$0xff] }
  0x38   : > { %4183 = vmatprep.subr.mxu0 %v4789_v38 }
  0x39   : > { %3863 = vmatmul.mubr.msk.f32.gmra.mrb[18].mxu1 %vm225_vm0, %v4650_v13 }
  0x3a   : > { %4089 = vmatmul.mubr.msk.f32.gmra.mrb[2].mxu0 %vm225_vm0, %v4736_v29  ;;  %3865 = vmatprep.mubr.msk.f32.mxu1 %vm225_vm0, %v4660_v15 }
  0x3b   : > { %4091 = vmatprep.mubr.msk.f32.mxu0 %vm225_vm0, %v4742_v31 }
  0x3d   : > { %3866 = vmatmul.mubr.msk.f32.gmra.mrb[20].mxu1 %vm225_vm0, %v4676_v17 }
  0x3e   : > { %4092 = vmatmul.mubr.msk.f32.gmra.mrb[4].mxu0 %vm225_vm0, %v4756_v33  ;;  %3868 = vmatprep.mubr.msk.f32.mxu1 %vm225_vm0, %v4682_v19 }
  0x3f   : > { %4094 = vmatprep.mubr.msk.f32.mxu0 %vm225_vm0, %v4762_v35 }
  0x41   : > { %3869 = vmatmul.mubr.msk.f32.gmra.mrb[22].mxu1 %vm225_vm0, %v4696_v21 }
  0x42   : > { %4095 = vmatmul.mubr.msk.f32.gmra.mrb[6].mxu0 %vm225_vm0, %v4776_v37  ;;  %3871 = vmatprep.mubr.msk.f32.mxu1 %vm225_vm0, %v4702_v23 }
  0x43   : > { %4097 = vmatprep.mubr.msk.f32.mxu0 %vm225_vm0, %v4818_v39 }
  0x45   : > { %3872 = vmatmul.mubr.msk.f32.gmra.mrb[24].mxu1 %vm225_vm0, %v4716_v25 }
  0x46   : > { %4098 = vmatmul.mubr.msk.f32.gmra.mrb[8].mxu0 %vm225_vm0, %v4829_v40  ;;  %3874 = vmatprep.mubr.msk.f32.mxu1 %vm225_vm0, %v4722_v27 }
  0x47   : > { %4100 = vmatprep.mubr.msk.f32.mxu0 %vm225_vm0, %v4832_v41 }
  0x49   : > { %3875 = vmatmul.mubr.msk.f32.gmra.mrb[26].mxu1 %vm225_vm0, %v4736_v29 }
  0x4a   : > { %4101 = vmatmul.mubr.msk.f32.gmra.mrb[10].mxu0 %vm225_vm0, %v4843_v42  ;;  %3877 = vmatprep.mubr.msk.f32.mxu1 %vm225_vm0, %v4742_v31 }
  0x4b   : > { %4103 = vmatprep.mubr.msk.f32.mxu0 %vm225_vm0, %v4846_v43 }
  0x4d   : > { %3878 = vmatmul.mubr.msk.f32.gmra.mrb[28].mxu1 %vm225_vm0, %v4756_v33 }
  0x4e   : > { %4104 = vmatmul.mubr.msk.f32.gmra.mrb[12].mxu0 %vm225_vm0, %v4857_v44  ;;  %3880 = vmatprep.mubr.msk.f32.mxu1 %vm225_vm0, %v4762_v35 }
  0x4f   : > { %4106 = vmatprep.mubr.msk.f32.mxu0 %vm225_vm0, %v4860_v45 }
  0x51   : > { %3881 = vmatmul.mubr.msk.f32.gmra.mrb[30].mxu1 %vm225_vm0, %v4776_v37 }
  0x52   : > { %4107 = vmatmul.mubr.msk.f32.gmra.mrb[14].mxu0 %vm225_vm0, %v4871_v46  ;;  %3885 = vmatprep.mubr.msk.f32.mxu1 %vm225_vm0, %v171_v47  ;;  %v5027_v47 = vld [vmem:[%s4608_s25 + $0x160] sm:$0xff] }
  0x53   : > { %4109 = vmatprep.mubr.msk.f32.mxu0 %vm225_vm0, %v4713_v24 }
  0x55   : > { %3886 = vmatmul.mubr.msk.f32.vlgmr.msra.gmra.mrb[0].mxu1 %vm225_vm0, %v4882_v48 }
  0x56   : > { %4110 = vmatmul.mubr.msk.f32.gmra.mrb[16].mxu0 %vm225_vm0, %v4719_v26  ;;  %3934 = vmatpush3.msra.mxu1 %v4644_v11  ;;  %v5022_v11 = vld [vmem:[%s4608_s25 + $0x150] sm:$0xff] }
  0x57   : > { %3888 = vmatprep.mubr.msk.f32.mxu1 %vm225_vm0, %v4885_v49  ;;  %4112 = vmatprep.mubr.msk.f32.mxu0 %vm225_vm0, %v4733_v28 }
  0x58   : > { %3983 = vmatprep.subr.mxu1 %v4890_v50 }
  0x59   : > { %3889 = vmatmul.mubr.msk.f32.gmra.mrb[2].mxu1 %vm225_vm0, %v4900_v51 }
  0x5a   : > { %4113 = vmatmul.mubr.msk.f32.gmra.mrb[18].mxu0 %vm225_vm0, %v4739_v30  ;;  %3891 = vmatprep.mubr.msk.f32.mxu1 %vm225_vm0, %v4905_v52 }
  0x5b   : > { %4115 = vmatprep.mubr.msk.f32.mxu0 %vm225_vm0, %v4753_v32 }
  0x5d   : > { %3892 = vmatmul.mubr.msk.f32.gmra.mrb[4].mxu1 %vm225_vm0, %v4917_v53 }
  0x5e   : > { %4116 = vmatmul.mubr.msk.f32.gmra.mrb[20].mxu0 %vm225_vm0, %v4759_v34  ;;  %3894 = vmatprep.mubr.msk.f32.mxu1 %vm225_vm0, %v4920_v54 }
  0x5f   : > { %4118 = vmatprep.mubr.msk.f32.mxu0 %vm225_vm0, %v4773_v36 }
  0x61   : > { %3895 = vmatmul.mubr.msk.f32.gmra.mrb[6].mxu1 %vm225_vm0, %v4931_v55 }
  0x62   : > { %4119 = vmatmul.mubr.msk.f32.gmra.mrb[22].mxu0 %vm225_vm0, %v4934_v56  ;;  %3897 = vmatprep.mubr.msk.f32.mxu1 %vm225_vm0, %v4611_v4  ;;  %v5007_v4 = vld [vmem:[%s4608_s25 + $0x140] sm:$0xff] }
  0x63   : > { %4121 = vmatprep.mubr.msk.f32.mxu0 %vm225_vm0, %v4937_v57 }
  0x65   : > { %3898 = vmatmul.mubr.msk.f32.gmra.mrb[8].mxu1 %vm225_vm0, %v4617_v6 }
  0x66   : > { %4122 = vmatmul.mubr.msk.f32.gmra.mrb[24].mxu0 %vm225_vm0, %v4948_v58  ;;  %3900 = vmatprep.mubr.msk.f32.mxu1 %vm225_vm0, %v4627_v8 }
  0x67   : > { %4124 = vmatprep.mubr.msk.f32.mxu0 %vm225_vm0, %v4951_v59 }
  0x69   : > { %3901 = vmatmul.mubr.msk.f32.gmra.mrb[10].mxu1 %vm225_vm0, %v4647_v12 }
  0x6a   : > { %4125 = vmatmul.mubr.msk.f32.gmra.mrb[26].mxu0 %vm225_vm0, %v4962_v60  ;;  %3903 = vmatprep.mubr.msk.f32.mxu1 %vm225_vm0, %v4657_v14 }
  0x6b   : > { %4127 = vmatprep.mubr.msk.f32.mxu0 %vm225_vm0, %v4965_v61 }
  0x6d   : > { %3904 = vmatmul.mubr.msk.f32.gmra.mrb[12].mxu1 %vm225_vm0, %v4673_v16 }
  0x6e   : > { %4128 = vmatmul.mubr.msk.f32.gmra.mrb[28].mxu0 %vm225_vm0, %v4976_v62  ;;  %3906 = vmatprep.mubr.msk.f32.mxu1 %vm225_vm0, %v4679_v18 }
  0x6f   : > { %4130 = vmatprep.mubr.msk.f32.mxu0 %vm225_vm0, %v4979_v63 }
  0x71   : > { %3907 = vmatmul.mubr.msk.f32.gmra.mrb[14].mxu1 %vm225_vm0, %v4693_v20 }
  0x72   : > { %4131 = vmatmul.mubr.msk.f32.gmra.mrb[30].mxu0 %vm225_vm0, %v4990_v0  ;;  %3909 = vmatprep.mubr.msk.f32.mxu1 %vm225_vm0, %v4993_v2  ;;  %v5042_v0 = vld [vmem:[%s4608_s25 + $0x180] sm:$0xff] }
  0x73   : > { %4135 = vmatprep.mubr.msk.f32.mxu0 %vm225_vm0, %v4882_v48 }
  0x75   : > { %3910 = vmatmul.mubr.msk.f32.gmra.mrb[16].mxu1 %vm225_vm0, %v5004_v3 }
  0x76   : > { %4136 = vmatmul.mubr.msk.f32.vlgmr.msra.gmra.mrb[0].mxu0 %vm225_vm0, %v4885_v49  ;;  %3912 = vmatprep.mubr.msk.f32.mxu1 %vm225_vm0, %v5007_v4 }
  0x77   : > { %4184 = vmatpush3.msra.mxu0 %v4789_v38  ;;  %4138 = vmatprep.mubr.msk.f32.mxu0 %vm225_vm0, %v4900_v51  ;;  %v5039_v38 = vld [vmem:[%s4608_s25 + $0x170] sm:$0xff]  ;;  %v5056_v51 = vld [vmem:[%s4608_s25 + $0x80] sm:$0xff] }
  0x78   : > { %4233 = vmatprep.subr.mxu0 %v5012_v10  ;;  %5524 = vst [vmem:[#allocation5_spill] sm:$0xff] %v5056_v51 }
  0x79   : > { %3913 = vmatmul.mubr.msk.f32.gmra.mrb[18].mxu1 %vm225_vm0, %v5022_v11 }
  0x7a   : > { %4139 = vmatmul.mubr.msk.f32.gmra.mrb[2].mxu0 %vm225_vm0, %v4905_v52  ;;  %3915 = vmatprep.mubr.msk.f32.mxu1 %vm225_vm0, %v5027_v47  ;;  %v5053_v52 = vld [vmem:[%s4608_s25 + $0x190] sm:$0xff] }
  0x7b   : > { %4141 = vmatprep.mubr.msk.f32.mxu0 %vm225_vm0, %v4917_v53 }
  0x7d   : > { %3916 = vmatmul.mubr.msk.f32.gmra.mrb[20].mxu1 %vm225_vm0, %v5039_v38 }
  0x7e   : > { %4142 = vmatmul.mubr.msk.f32.gmra.mrb[4].mxu0 %vm225_vm0, %v4920_v54  ;;  %3918 = vmatprep.mubr.msk.f32.mxu1 %vm225_vm0, %v5042_v0 }
  0x7f   : > { %4144 = vmatprep.mubr.msk.f32.mxu0 %vm225_vm0, %v4931_v55 }
  0x81   : > { %3919 = vmatmul.mubr.msk.f32.gmra.mrb[22].mxu1 %vm225_vm0, %v5053_v52 }
  0x82   : > { %4145 = vmatmul.mubr.msk.f32.gmra.mrb[6].mxu0 %vm225_vm0, %v5056_v51  ;;  %3921 = vmatprep.mubr.msk.f32.mxu1 %vm225_vm0, %v4614_v5  ;;  %v5091_v51 = vld [vmem:[%s4608_s25 + $0x110] sm:$0xff] }
  0x83   : > { %4147 = vmatprep.mubr.msk.f32.mxu0 %vm225_vm0, %v4617_v6 }
  0x85   : > { %3922 = vmatmul.mubr.msk.f32.gmra.mrb[24].mxu1 %vm225_vm0, %v4624_v7 }
  0x86   : > { %4148 = vmatmul.mubr.msk.f32.gmra.mrb[8].mxu0 %vm225_vm0, %v4627_v8  ;;  %3924 = vmatprep.mubr.msk.f32.mxu1 %vm225_vm0, %v4630_v9 }
  0x87   : > { %4150 = vmatprep.mubr.msk.f32.mxu0 %vm225_vm0, %v4647_v12 }
  0x89   : > { %3925 = vmatmul.mubr.msk.f32.gmra.mrb[26].mxu1 %vm225_vm0, %v4650_v13 }
  0x8a   : > { %4151 = vmatmul.mubr.msk.f32.gmra.mrb[10].mxu0 %vm225_vm0, %v4657_v14  ;;  %3927 = vmatprep.mubr.msk.f32.mxu1 %vm225_vm0, %v4660_v15 }
  0x8b   : > { %4153 = vmatprep.mubr.msk.f32.mxu0 %vm225_vm0, %v4673_v16 }
  0x8d   : > { %3928 = vmatmul.mubr.msk.f32.gmra.mrb[28].mxu1 %vm225_vm0, %v4676_v17 }
  0x8e   : > { %4154 = vmatmul.mubr.msk.f32.gmra.mrb[12].mxu0 %vm225_vm0, %v4679_v18  ;;  %3930 = vmatprep.mubr.msk.f32.mxu1 %vm225_vm0, %v4682_v19 }
  0x8f   : > { %4156 = vmatprep.mubr.msk.f32.mxu0 %vm225_vm0, %v4693_v20 }
  0x91   : > { %3931 = vmatmul.mubr.msk.f32.gmra.mrb[30].mxu1 %vm225_vm0, %v4696_v21 }
  0x92   : > { %4157 = vmatmul.mubr.msk.f32.gmra.mrb[14].mxu0 %vm225_vm0, %v5091_v51  ;;  %3935 = vmatprep.mubr.msk.f32.mxu1 %vm225_vm0, %v4699_v22  ;;  %v3392_v22 = vld [vmem:[%s4608_s25 + $0x1a0] sm:$0xff] }
  0x93   : > { %4159 = vmatprep.mubr.msk.f32.mxu0 %vm225_vm0, %v5004_v3 }
  0x95   : > { %3936 = vmatmul.mubr.msk.f32.vlgmr.msra.gmra.mrb[0].mxu1 %vm225_vm0, %v4713_v24 }
  0x96   : > { %4160 = vmatmul.mubr.msk.f32.gmra.mrb[16].mxu0 %vm225_vm0, %v5007_v4  ;;  %3984 = vmatpush3.msra.mxu1 %v4890_v50  ;;  %v3205_v50 = vld [vmem:[%s4608_s25 + $0x91] sm:$0xff] }
  0x97   : > { %3938 = vmatprep.mubr.msk.f32.mxu1 %vm225_vm0, %v4719_v26  ;;  %4162 = vmatprep.mubr.msk.f32.mxu0 %vm225_vm0, %v5022_v11 }
  0x98   : > { %4283 = vmatprep.subr.mxu1 %v4592_v1 }
  0x99   : > { %3939 = vmatmul.mubr.msk.f32.gmra.mrb[2].mxu1 %vm225_vm0, %v4733_v28 }
  0x9a   : > { %4163 = vmatmul.mubr.msk.f32.gmra.mrb[18].mxu0 %vm225_vm0, %v5027_v47  ;;  %3941 = vmatprep.mubr.msk.f32.mxu1 %vm225_vm0, %v4739_v30 }
  0x9b   : > { %4165 = vmatprep.mubr.msk.f32.mxu0 %vm225_vm0, %v5039_v38 }
  0x9d   : > { %3942 = vmatmul.mubr.msk.f32.gmra.mrb[4].mxu1 %vm225_vm0, %v4753_v32 }
  0x9e   : > { %4166 = vmatmul.mubr.msk.f32.gmra.mrb[20].mxu0 %vm225_vm0, %v5042_v0  ;;  %3944 = vmatprep.mubr.msk.f32.mxu1 %vm225_vm0, %v4759_v34 }
  0x9f   : > { %4168 = vmatprep.mubr.msk.f32.mxu0 %vm225_vm0, %v5053_v52 }
  0xa1   : > { %3945 = vmatmul.mubr.msk.f32.gmra.mrb[6].mxu1 %vm225_vm0, %v4773_v36 }
  0xa2   : > { %4169 = vmatmul.mubr.msk.f32.gmra.mrb[22].mxu0 %vm225_vm0, %v3392_v22  ;;  %3947 = vmatprep.mubr.msk.f32.mxu1 %vm225_vm0, %v3205_v50  ;;  %v3400_v22 = vld [vmem:[%s4608_s25 + $0x230] sm:$0xff] }
  0xa3   : > { %4171 = vmatprep.mubr.msk.f32.mxu0 %vm225_vm0, %v4624_v7 }
  0xa5   : > { %3948 = vmatmul.mubr.msk.f32.gmra.mrb[8].mxu1 %vm225_vm0, %v4937_v57 }
  0xa6   : > { %4172 = vmatmul.mubr.msk.f32.gmra.mrb[24].mxu0 %vm225_vm0, %v4630_v9  ;;  %3950 = vmatprep.mubr.msk.f32.mxu1 %vm225_vm0, %v4948_v58 }
  0xa7   : > { %4174 = vmatprep.mubr.msk.f32.mxu0 %vm225_vm0, %v4650_v13 }
  0xa9   : > { %3951 = vmatmul.mubr.msk.f32.gmra.mrb[10].mxu1 %vm225_vm0, %v4951_v59 }
  0xaa   : > { %4175 = vmatmul.mubr.msk.f32.gmra.mrb[26].mxu0 %vm225_vm0, %v4660_v15  ;;  %3953 = vmatprep.mubr.msk.f32.mxu1 %vm225_vm0, %v4962_v60 }
  0xab   : > { %4177 = vmatprep.mubr.msk.f32.mxu0 %vm225_vm0, %v4676_v17 }
  0xad   : > { %3954 = vmatmul.mubr.msk.f32.gmra.mrb[12].mxu1 %vm225_vm0, %v4965_v61 }
  0xae   : > { %4178 = vmatmul.mubr.msk.f32.gmra.mrb[28].mxu0 %vm225_vm0, %v4682_v19  ;;  %3956 = vmatprep.mubr.msk.f32.mxu1 %vm225_vm0, %v4976_v62 }
  0xaf   : > { %4180 = vmatprep.mubr.msk.f32.mxu0 %vm225_vm0, %v4696_v21 }
  0xb1   : > { %3957 = vmatmul.mubr.msk.f32.gmra.mrb[14].mxu1 %vm225_vm0, %v4979_v63 }
  0xb2   : > { %4181 = vmatmul.mubr.msk.f32.gmra.mrb[30].mxu0 %vm225_vm0, %v3400_v22  ;;  %3959 = vmatprep.mubr.msk.f32.mxu1 %vm225_vm0, %v4702_v23 }
  0xb3   : > { %4185 = vmatprep.mubr.msk.f32.mxu0 %vm225_vm0, %v4617_v6 }
  0xb5   : > { %3960 = vmatmul.mubr.msk.f32.gmra.mrb[16].mxu1 %vm225_vm0, %v4716_v25 }
  0xb6   : > { %4186 = vmatmul.mubr.msk.f32.vlgmr.msra.gmra.mrb[0].mxu0 %vm225_vm0, %v4627_v8  ;;  %3962 = vmatprep.mubr.msk.f32.mxu1 %vm225_vm0, %v4722_v27 }
  0xb7   : > { %4234 = vmatpush3.msra.mxu0 %v5012_v10  ;;  %4188 = vmatprep.mubr.msk.f32.mxu0 %vm225_vm0, %v4647_v12 }
  0xb9   : > { %3963 = vmatmul.mubr.msk.f32.gmra.mrb[18].mxu1 %vm225_vm0, %v4736_v29 }
  0xba   : > { %4189 = vmatmul.mubr.msk.f32.gmra.mrb[2].mxu0 %vm225_vm0, %v4657_v14  ;;  %3965 = vmatprep.mubr.msk.f32.mxu1 %vm225_vm0, %v4742_v31 }
  0xbb   : > { %4191 = vmatprep.mubr.msk.f32.mxu0 %vm225_vm0, %v4673_v16 }
  0xbd   : > { %3966 = vmatmul.mubr.msk.f32.gmra.mrb[20].mxu1 %vm225_vm0, %v4756_v33 }
  0xbe   : > { %4192 = vmatmul.mubr.msk.f32.gmra.mrb[4].mxu0 %vm225_vm0, %v4679_v18  ;;  %3968 = vmatprep.mubr.msk.f32.mxu1 %vm225_vm0, %v4762_v35 }
  0xbf   : > { %4194 = vmatprep.mubr.msk.f32.mxu0 %vm225_vm0, %v4693_v20 }
  0xc1   : > { %3969 = vmatmul.mubr.msk.f32.gmra.mrb[22].mxu1 %vm225_vm0, %v4776_v37 }
  0xc2   : > { %4195 = vmatmul.mubr.msk.f32.gmra.mrb[6].mxu0 %vm225_vm0, %v5091_v51  ;;  %3971 = vmatprep.mubr.msk.f32.mxu1 %vm225_vm0, %v4818_v39 }
  0xc3   : > { %4197 = vmatprep.mubr.msk.f32.mxu0 %vm225_vm0, %v4713_v24 }
  0xc5   : > { %3972 = vmatmul.mubr.msk.f32.gmra.mrb[24].mxu1 %vm225_vm0, %v4829_v40 }
  0xc6   : > { %4198 = vmatmul.mubr.msk.f32.gmra.mrb[8].mxu0 %vm225_vm0, %v4719_v26  ;;  %3974 = vmatprep.mubr.msk.f32.mxu1 %vm225_vm0, %v4832_v41 }
  0xc7   : > { %4200 = vmatprep.mubr.msk.f32.mxu0 %vm225_vm0, %v4733_v28 }
  0xc9   : > { %3975 = vmatmul.mubr.msk.f32.gmra.mrb[26].mxu1 %vm225_vm0, %v4843_v42 }
  0xca   : > { %4201 = vmatmul.mubr.msk.f32.gmra.mrb[10].mxu0 %vm225_vm0, %v4739_v30  ;;  %3977 = vmatprep.mubr.msk.f32.mxu1 %vm225_vm0, %v4846_v43 }
  0xcb   : > { %4203 = vmatprep.mubr.msk.f32.mxu0 %vm225_vm0, %v4753_v32 }
  0xcd   : > { %3978 = vmatmul.mubr.msk.f32.gmra.mrb[28].mxu1 %vm225_vm0, %v4857_v44 }
  0xce   : > { %4204 = vmatmul.mubr.msk.f32.gmra.mrb[12].mxu0 %vm225_vm0, %v4759_v34  ;;  %3980 = vmatprep.mubr.msk.f32.mxu1 %vm225_vm0, %v4860_v45 }
  0xcf   : > { %4206 = vmatprep.mubr.msk.f32.mxu0 %vm225_vm0, %v4773_v36 }
  0xd1   : > { %3981 = vmatmul.mubr.msk.f32.gmra.mrb[30].mxu1 %vm225_vm0, %v4871_v46 }
  0xd2   : > { %4207 = vmatmul.mubr.msk.f32.gmra.mrb[14].mxu0 %vm225_vm0, %v4934_v56  ;;  %3985 = vmatprep.mubr.msk.f32.mxu1 %vm225_vm0, %v4993_v2 }
  0xd3   : > { %4209 = vmatprep.mubr.msk.f32.mxu0 %vm225_vm0, %v4624_v7 }
  0xd5   : > { %3986 = vmatmul.mubr.msk.f32.vlgmr.msra.gmra.mrb[0].mxu1 %vm225_vm0, %v5004_v3 }
  0xd6   : > { %4210 = vmatmul.mubr.msk.f32.gmra.mrb[16].mxu0 %vm225_vm0, %v4630_v9  ;;  %4284 = vmatpush3.msra.mxu1 %v4592_v1  ;;  %v3441_v1 = vld [vmem:[%s4608_s25 + $0x1a1] sm:$0xff] }
  0xd7   : > { %3988 = vmatprep.mubr.msk.f32.mxu1 %vm225_vm0, %v5007_v4  ;;  %4212 = vmatprep.mubr.msk.f32.mxu0 %vm225_vm0, %v4650_v13 }
  0xd9   : > { %3989 = vmatmul.mubr.msk.f32.gmra.mrb[2].mxu1 %vm225_vm0, %v5022_v11 }
  0xda   : > { %4213 = vmatmul.mubr.msk.f32.gmra.mrb[18].mxu0 %vm225_vm0, %v4660_v15  ;;  %3991 = vmatprep.mubr.msk.f32.mxu1 %vm225_vm0, %v5027_v47 }
  0xdb   : > { %4215 = vmatprep.mubr.msk.f32.mxu0 %vm225_vm0, %v4676_v17 }
  0xdd   : > { %3992 = vmatmul.mubr.msk.f32.gmra.mrb[4].mxu1 %vm225_vm0, %v5039_v38 }
  0xde   : > { %4216 = vmatmul.mubr.msk.f32.gmra.mrb[20].mxu0 %vm225_vm0, %v4682_v19  ;;  %3994 = vmatprep.mubr.msk.f32.mxu1 %vm225_vm0, %v5042_v0 }
  0xdf   : > { %4218 = vmatprep.mubr.msk.f32.mxu0 %vm225_vm0, %v4696_v21 }
  0xe1   : > { %3995 = vmatmul.mubr.msk.f32.gmra.mrb[6].mxu1 %vm225_vm0, %v5053_v52 }
  0xe2   : > { %4219 = vmatmul.mubr.msk.f32.gmra.mrb[22].mxu0 %vm225_vm0, %v3400_v22  ;;  %3997 = vmatprep.mubr.msk.f32.mxu1 %vm225_vm0, %v4614_v5  ;;  %v5525_v5 = vld [vmem:[#allocation2_spill] sm:$0xff] }
  0xe3   : > { %4221 = vmatprep.mubr.msk.f32.mxu0 %vm225_vm0, %v4716_v25 }
  0xe5   : > { %3998 = vmatmul.mubr.msk.f32.gmra.mrb[8].mxu1 %vm225_vm0, %v4624_v7  ;;  %v5526_v7 = vld [vmem:[#allocation3_spill] sm:$0xff] }
  0xe6   : > { %4222 = vmatmul.mubr.msk.f32.gmra.mrb[24].mxu0 %vm225_vm0, %v4722_v27  ;;  %4000 = vmatprep.mubr.msk.f32.mxu1 %vm225_vm0, %v4630_v9  ;;  %v5527_v9 = vld [vmem:[#allocation5_spill] sm:$0xff] }
  0xe7   : > { %4224 = vmatprep.mubr.msk.f32.mxu0 %vm225_vm0, %v4736_v29 }
  0xe9   : > { %4001 = vmatmul.mubr.msk.f32.gmra.mrb[10].mxu1 %vm225_vm0, %v4650_v13  ;;  %v5528_v13 = vld [vmem:[#allocation4_spill] sm:$0xff] }
  0xea   : > { %4225 = vmatmul.mubr.msk.f32.gmra.mrb[26].mxu0 %vm225_vm0, %v4742_v31  ;;  %4003 = vmatprep.mubr.msk.f32.mxu1 %vm225_vm0, %v4660_v15 }
  0xeb   : > { %4227 = vmatprep.mubr.msk.f32.mxu0 %vm225_vm0, %v4756_v33 }
  0xed   : > { %4004 = vmatmul.mubr.msk.f32.gmra.mrb[12].mxu1 %vm225_vm0, %v4676_v17 }
  0xee   : > { %4228 = vmatmul.mubr.msk.f32.gmra.mrb[28].mxu0 %vm225_vm0, %v4762_v35  ;;  %4006 = vmatprep.mubr.msk.f32.mxu1 %vm225_vm0, %v4682_v19 }
  0xef   : > { %4230 = vmatprep.mubr.msk.f32.mxu0 %vm225_vm0, %v4776_v37 }
  0xf1   : > { %4007 = vmatmul.mubr.msk.f32.gmra.mrb[14].mxu1 %vm225_vm0, %v4696_v21 }
  0xf2   : > { %4231 = vmatmul.mubr.msk.f32.gmra.mrb[30].mxu0 %vm225_vm0, %v3441_v1  ;;  %4009 = vmatprep.mubr.msk.f32.mxu1 %vm225_vm0, %v4882_v48 }
  0xf3   : > { %4235 = vmatprep.mubr.msk.f32.mxu0 %vm225_vm0, %v4713_v24 }
  0xf5   : > { %4010 = vmatmul.mubr.msk.f32.gmra.mrb[16].mxu1 %vm225_vm0, %v4885_v49 }
  0xf6   : > { %4236 = vmatmul.mubr.msk.f32.vlgmr.msra.gmra.mrb[0].mxu0 %vm225_vm0, %v4719_v26  ;;  %4012 = vmatprep.mubr.msk.f32.mxu1 %vm225_vm0, %v5525_v5 }
  0xf7   : > { %4238 = vmatprep.mubr.msk.f32.mxu0 %vm225_vm0, %v4733_v28 }
  0xf9   : > { %4013 = vmatmul.mubr.msk.f32.gmra.mrb[18].mxu1 %vm225_vm0, %v5526_v7 }
  0xfa   : > { %4239 = vmatmul.mubr.msk.f32.gmra.mrb[2].mxu0 %vm225_vm0, %v4739_v30  ;;  %4015 = vmatprep.mubr.msk.f32.mxu1 %vm225_vm0, %v4917_v53 }
  0xfb   : > { %4241 = vmatprep.mubr.msk.f32.mxu0 %vm225_vm0, %v4753_v32 }
  0xfd   : > { %4016 = vmatmul.mubr.msk.f32.gmra.mrb[20].mxu1 %vm225_vm0, %v4920_v54 }
  0xfe   : > { %4242 = vmatmul.mubr.msk.f32.gmra.mrb[4].mxu0 %vm225_vm0, %v4759_v34  ;;  %4018 = vmatprep.mubr.msk.f32.mxu1 %vm225_vm0, %v4931_v55 }
  0xff   : > { %4244 = vmatprep.mubr.msk.f32.mxu0 %vm225_vm0, %v4773_v36 }
 0x101   : > { %4019 = vmatmul.mubr.msk.f32.gmra.mrb[22].mxu1 %vm225_vm0, %v5527_v9 }
 0x102   : > { %4245 = vmatmul.mubr.msk.f32.gmra.mrb[6].mxu0 %vm225_vm0, %v4934_v56  ;;  %4021 = vmatprep.mubr.msk.f32.mxu1 %vm225_vm0, %v4617_v6 }
 0x103   : > { %4247 = vmatprep.mubr.msk.f32.mxu0 %vm225_vm0, %v4937_v57 }
 0x105   : > { %4022 = vmatmul.mubr.msk.f32.gmra.mrb[24].mxu1 %vm225_vm0, %v4627_v8 }
 0x106   : > { %4248 = vmatmul.mubr.msk.f32.gmra.mrb[8].mxu0 %vm225_vm0, %v4948_v58  ;;  %4024 = vmatprep.mubr.msk.f32.mxu1 %vm225_vm0, %v4647_v12 }
 0x107   : > { %4250 = vmatprep.mubr.msk.f32.mxu0 %vm225_vm0, %v4951_v59 }
 0x109   : > { %4025 = vmatmul.mubr.msk.f32.gmra.mrb[26].mxu1 %vm225_vm0, %v4657_v14 }
 0x10a   : > { %4251 = vmatmul.mubr.msk.f32.gmra.mrb[10].mxu0 %vm225_vm0, %v4962_v60  ;;  %4027 = vmatprep.mubr.msk.f32.mxu1 %vm225_vm0, %v4673_v16 }
 0x10b   : > { %4253 = vmatprep.mubr.msk.f32.mxu0 %vm225_vm0, %v4965_v61 }
 0x10d   : > { %4028 = vmatmul.mubr.msk.f32.gmra.mrb[28].mxu1 %vm225_vm0, %v4679_v18 }
 0x10e   : > { %4254 = vmatmul.mubr.msk.f32.gmra.mrb[12].mxu0 %vm225_vm0, %v4976_v62  ;;  %4030 = vmatprep.mubr.msk.f32.mxu1 %vm225_vm0, %v4693_v20 }
 0x10f   : > { %4256 = vmatprep.mubr.msk.f32.mxu0 %vm225_vm0, %v4979_v63 }
 0x111   : > { %4031 = vmatmul.mubr.msk.f32.gmra.mrb[30].mxu1 %vm225_vm0, %v5091_v51 }
 0x112   : > { %4257 = vmatmul.mubr.msk.f32.gmra.mrb[14].mxu0 %vm225_vm0, %v5528_v13  ;;  %4059 = vmatprep.mubr.msk.f32.mxu1 %vm225_vm0, %v4617_v6  ;;  %v3482_v6 = vld [vmem:[%s4608_s25 + $0x231] sm:$0xff] }
 0x113   : > { %4259 = vmatprep.mubr.msk.f32.mxu0 %vm225_vm0, %v4716_v25 }
 0x115   : > { %4060 = vmatmul.mubr.msk.f32.vlgmr.msra.gmra.mrb[16].mxu1 %vm225_vm0, %v4627_v8 }
 0x116   : > { %4260 = vmatmul.mubr.msk.f32.gmra.mrb[16].mxu0 %vm225_vm0, %v4722_v27  ;;  %4062 = vmatprep.mubr.msk.f32.mxu1 %vm225_vm0, %v4647_v12 }
 0x117   : > { %4262 = vmatprep.mubr.msk.f32.mxu0 %vm225_vm0, %v4736_v29 }
 0x119   : > { %4063 = vmatmul.mubr.msk.f32.gmra.mrb[18].mxu1 %vm225_vm0, %v4657_v14 }
 0x11a   : > { %4263 = vmatmul.mubr.msk.f32.gmra.mrb[18].mxu0 %vm225_vm0, %v4742_v31  ;;  %4065 = vmatprep.mubr.msk.f32.mxu1 %vm225_vm0, %v4673_v16 }
 0x11b   : > { %4265 = vmatprep.mubr.msk.f32.mxu0 %vm225_vm0, %v4756_v33 }
 0x11d   : > { %4066 = vmatmul.mubr.msk.f32.gmra.mrb[20].mxu1 %vm225_vm0, %v4679_v18 }
 0x11e   : > { %4266 = vmatmul.mubr.msk.f32.gmra.mrb[20].mxu0 %vm225_vm0, %v4762_v35  ;;  %4068 = vmatprep.mubr.msk.f32.mxu1 %vm225_vm0, %v4693_v20 }
 0x11f   : > { %4268 = vmatprep.mubr.msk.f32.mxu0 %vm225_vm0, %v4776_v37 }
 0x121   : > { %4069 = vmatmul.mubr.msk.f32.gmra.mrb[22].mxu1 %vm225_vm0, %v5091_v51 }
 0x122   : > { %4269 = vmatmul.mubr.msk.f32.gmra.mrb[22].mxu0 %vm225_vm0, %v3441_v1  ;;  %4071 = vmatprep.mubr.msk.f32.mxu1 %vm225_vm0, %v4713_v24 }
 0x123   : > { %4271 = vmatprep.mubr.msk.f32.mxu0 %vm225_vm0, %v4829_v40 }
 0x125   : > { %4072 = vmatmul.mubr.msk.f32.gmra.mrb[24].mxu1 %vm225_vm0, %v4719_v26 }
 0x126   : > { %4272 = vmatmul.mubr.msk.f32.gmra.mrb[24].mxu0 %vm225_vm0, %v4832_v41  ;;  %4074 = vmatprep.mubr.msk.f32.mxu1 %vm225_vm0, %v4733_v28 }
 0x127   : > { %4274 = vmatprep.mubr.msk.f32.mxu0 %vm225_vm0, %v4843_v42 }
 0x129   : > { %4075 = vmatmul.mubr.msk.f32.gmra.mrb[26].mxu1 %vm225_vm0, %v4739_v30 }
 0x12a   : > { %4275 = vmatmul.mubr.msk.f32.gmra.mrb[26].mxu0 %vm225_vm0, %v4846_v43  ;;  %4077 = vmatprep.mubr.msk.f32.mxu1 %vm225_vm0, %v4753_v32 }
 0x12b   : > { %4277 = vmatprep.mubr.msk.f32.mxu0 %vm225_vm0, %v4857_v44 }
 0x12d   : > { %4078 = vmatmul.mubr.msk.f32.gmra.mrb[28].mxu1 %vm225_vm0, %v4759_v34 }
 0x12e   : > { %4278 = vmatmul.mubr.msk.f32.gmra.mrb[28].mxu0 %vm225_vm0, %v4860_v45  ;;  %4080 = vmatprep.mubr.msk.f32.mxu1 %vm225_vm0, %v4773_v36 }
 0x12f   : > { %4280 = vmatprep.mubr.msk.f32.mxu0 %vm225_vm0, %v4871_v46 }
 0x131   : > { %4081 = vmatmul.mubr.msk.f32.gmra.mrb[30].mxu1 %vm225_vm0, %v4934_v56 }
 0x132   : > { %4281 = vmatmul.mubr.msk.f32.gmra.mrb[30].mxu0 %vm225_vm0, %v3482_v6 }
 0x1a8   : > { %v3987_v8 = vpop.f32.mrb[0].mxu1 }
 0x1a9   : > { %v1277_v12 = vpop.f32.mrb[1].mxu1 }
 0x1ac   : > { %v3990_v14 = vpop.f32.mrb[2].mxu1 }
 0x1ad   : > { %v1287_v15 = vpop.f32.mrb[3].mxu1 }
 0x1b0   : > { %v3993_v16 = vpop.f32.mrb[4].mxu1 }
 0x1b1   : > { %v1297_v17 = vpop.f32.mrb[5].mxu1 }
 0x1b4   : > { %v3996_v18 = vpop.f32.mrb[6].mxu1 }
 0x1b5   : > { %v1307_v19 = vpop.f32.mrb[7].mxu1 }
 0x1b8   : > { %v3999_v20 = vpop.f32.mrb[8].mxu1 }
 0x1b9   : > { %v1317_v21 = vpop.f32.mrb[9].mxu1 }
 0x1bc   : > { %v4002_v23 = vpop.f32.mrb[10].mxu1 }
 0x1bd   : > { %v1327_v24 = vpop.f32.mrb[11].mxu1 }
 0x1c0   : > { %v4005_v25 = vpop.f32.mrb[12].mxu1 }
 0x1c1   : > { %v1337_v26 = vpop.f32.mrb[13].mxu1 }
 0x1c4   : > { %v4008_v27 = vpop.f32.mrb[14].mxu1 }
 0x1c5   : > { %v1347_v28 = vpop.f32.mrb[15].mxu1 }
 0x1c9   : > { %v4237_v29 = vpop.f32.mrb[0].mxu0 }
 0x1ca   : > { %v5419_v30 = vadd.f32 %v4237_v29, %v3987_v8  ;;  %v2766_v31 = vpop.f32.mrb[1].mxu0 }
 0x1cb   : > { %v5421_v32 = vadd.f32 %v2766_v31, %v1277_v12 }
 0x1cd   : > { %v4240_v33 = vpop.f32.mrb[2].mxu0 }
 0x1ce   : > { %v5423_v34 = vadd.f32 %v4240_v33, %v3990_v14  ;;  %v2776_v35 = vpop.f32.mrb[3].mxu0 }
 0x1cf   : > { %v5425_v36 = vadd.f32 %v2776_v35, %v1287_v15 }
 0x1d1   : > { %v4243_v37 = vpop.f32.mrb[4].mxu0 }
 0x1d2   : > { %v5427_v39 = vadd.f32 %v4243_v37, %v3993_v16  ;;  %v2786_v40 = vpop.f32.mrb[5].mxu0 }
 0x1d3   : > { %v5429_v41 = vadd.f32 %v2786_v40, %v1297_v17  ;;  %v3516_v40 = vld [vmem:[%s5515_s2] ss:$0 sm:$0xff] }
 0x1d5   : > { %v4246_v42 = vpop.f32.mrb[6].mxu0 }
 0x1d6   : > { %v5431_v43 = vadd.f32 %v4246_v42, %v3996_v18  ;;  %v2796_v44 = vpop.f32.mrb[7].mxu0 }
 0x1d7   : > { %v5433_v45 = vadd.f32 %v2796_v44, %v1307_v19 }
 0x1d9   : > { %v4249_v46 = vpop.f32.mrb[8].mxu0 }
 0x1da   : > { %v4293_v48 = vadd.f32 %v4249_v46, %v3999_v20  ;;  %v2806_v49 = vpop.f32.mrb[9].mxu0 }
 0x1db   : > { %v4294_v51 = vadd.f32 %v2806_v49, %v1317_v21 }
 0x1dc   : > { %v2958_v52 = vmax.f32 %v5419_v30, %v4293_v48 }
 0x1dd   : > { %v2957_v53 = vmax.f32 %v5421_v32, %v4294_v51  ;;  %v4252_v54 = vpop.f32.mrb[10].mxu0 }
 0x1de   : > { %v5437_v55 = vadd.f32 %v4252_v54, %v4002_v23  ;;  %v2816_v56 = vpop.f32.mrb[11].mxu0 }
 0x1df   : > { %v5439_v57 = vadd.f32 %v2816_v56, %v1327_v24 }
 0x1e0   : > { %v2960_v58 = vmax.f32 %v5423_v34, %v5437_v55 }
 0x1e1   : > { %v2959_v59 = vmax.f32 %v5425_v36, %v5439_v57  ;;  %v4255_v60 = vpop.f32.mrb[12].mxu0 }
 0x1e2   : > { %v5445_v61 = vadd.f32 %v4255_v60, %v4005_v25  ;;  %v2826_v62 = vpop.f32.mrb[13].mxu0 }
 0x1e3   : > { %v5447_v63 = vadd.f32 %v2826_v62, %v1337_v26 }
 0x1e4   : > { %v2962_v0 = vmax.f32 %v5427_v39, %v5445_v61 }
 0x1e5   : > { %v2961_v2 = vmax.f32 %v5429_v41, %v5447_v63  ;;  %v4258_v3 = vpop.f32.mrb[14].mxu0 }
 0x1e6   : > { %v5453_v4 = vadd.f32 %v4258_v3, %v4008_v27  ;;  %v2836_v10 = vpop.f32.mrb[15].mxu0 }
 0x1e7   : > { %v5455_v11 = vadd.f32 %v2836_v10, %v1347_v28 }
 0x1e8   : > { %v2964_v47 = vmax.f32 %v5431_v43, %v5453_v4  ;;  %v4061_v50 = vpop.f32.mrb[16].mxu1 }
 0x1e9   : > { %v2963_v38 = vmax.f32 %v5433_v45, %v5455_v11  ;;  %v4261_v22 = vpop.f32.mrb[16].mxu0  ;;  %v1648_v5 = vpop.f32.mrb[17].mxu1 }
 0x1ea   : > { %v4301_v1 = vadd.f32 %v4261_v22, %v4061_v50  ;;  %v2846_v7 = vpop.f32.mrb[17].mxu0 }
 0x1eb   : > { %v4302_v9 = vadd.f32 %v2846_v7, %v1648_v5 }
 0x1ec   : > { %v4064_v13 = vpop.f32.mrb[18].mxu1 }
 0x1ed   : > { %v4264_v6 = vpop.f32.mrb[18].mxu0  ;;  %v1658_v12 = vpop.f32.mrb[19].mxu1 }
 0x1ee   : > { %v4303_v8 = vadd.f32 %v4264_v6, %v4064_v13  ;;  %v2856_v14 = vpop.f32.mrb[19].mxu0 }
 0x1ef   : > { %v4304_v15 = vadd.f32 %v2856_v14, %v1658_v12 }
 0x1f0   : > { %v4067_v16 = vpop.f32.mrb[20].mxu1 }
 0x1f1   : > { %v4267_v17 = vpop.f32.mrb[20].mxu0  ;;  %v1668_v19 = vpop.f32.mrb[21].mxu1 }
 0x1f2   : > { %v4305_v18 = vadd.f32 %v4267_v17, %v4067_v16  ;;  %v2866_v20 = vpop.f32.mrb[21].mxu0 }
 0x1f3   : > { %v4306_v21 = vadd.f32 %v2866_v20, %v1668_v19 }
 0x1f4   : > { %v4070_v23 = vpop.f32.mrb[22].mxu1 }
 0x1f5   : > { %v4270_v24 = vpop.f32.mrb[22].mxu0  ;;  %v1678_v26 = vpop.f32.mrb[23].mxu1 }
 0x1f6   : > { %v5461_v25 = vadd.f32 %v4270_v24, %v4070_v23  ;;  %v2876_v27 = vpop.f32.mrb[23].mxu0 }
 0x1f7   : > { %v5463_v28 = vadd.f32 %v2876_v27, %v1678_v26 }
 0x1f8   : > { %v4073_v29 = vpop.f32.mrb[24].mxu1 }
 0x1f9   : > { %v4273_v30 = vpop.f32.mrb[24].mxu0  ;;  %v1688_v32 = vpop.f32.mrb[25].mxu1 }
 0x1fa   : > { %v4309_v31 = vadd.f32 %v4273_v30, %v4073_v29  ;;  %v2886_v33 = vpop.f32.mrb[25].mxu0 }
 0x1fb   : > { %v4310_v35 = vadd.f32 %v2886_v33, %v1688_v32 }
 0x1fc   : > { %v2966_v37 = vmax.f32 %v4301_v1, %v4309_v31  ;;  %v4076_v44 = vpop.f32.mrb[26].mxu1 }
 0x1fd   : > { %v2965_v42 = vmax.f32 %v4302_v9, %v4310_v35  ;;  %v4276_v46 = vpop.f32.mrb[26].mxu0  ;;  %v1698_v51 = vpop.f32.mrb[27].mxu1 }
 0x1fe   : > { %v2974_v48 = vmax.f32 %v2958_v52, %v2966_v37  ;;  %v4311_v49 = vadd.f32 %v4276_v46, %v4076_v44  ;;  %v2896_v54 = vpop.f32.mrb[27].mxu0 }
 0x1ff   : > { %v2973_v56 = vmax.f32 %v2957_v53, %v2965_v42  ;;  %v4312_v60 = vadd.f32 %v2896_v54, %v1698_v51 }
 0x200   : > { %v2989_v62 = vadd.f32 %v3516_v40, %v2974_v48  ;;  %v2968_v3 = vmax.f32 %v4303_v8, %v4311_v49  ;;  %v4079_v22 = vpop.f32.mrb[28].mxu1 }
 0x201   : > { %v2988_v10 = vadd.f32 %v3516_v40, %v2973_v56  ;;  %v2967_v50 = vmax.f32 %v4304_v15, %v4312_v60  ;;  %v4279_v1 = vpop.f32.mrb[28].mxu0  ;;  %v1708_v13 = vpop.f32.mrb[29].mxu1 }
 0x202   : > { %v2997_v5 = vmax.f32 %v2989_v62, 0.0  ;;  %v2976_v7 = vmax.f32 %v2960_v58, %v2968_v3  ;;  %v4313_v9 = vadd.f32 %v4279_v1, %v4079_v22  ;;  %v2906_v52 = vpop.f32.mrb[29].mxu0 }
 0x203   : > { %v2996_v53 = vmax.f32 %v2988_v10, 0.0  ;;  %v2975_v6 = vmax.f32 %v2959_v59, %v2967_v50  ;;  %v4314_v8 = vadd.f32 %v2906_v52, %v1708_v13 }
 0x204   : > { %v3529_v12 = vpack.c.bf16 %v2997_v5, %v2997_v5  ;;  %v2991_v34 = vadd.f32 %v3516_v40, %v2976_v7  ;;  %v2970_v55 = vmax.f32 %v4305_v18, %v4313_v9  ;;  %v4082_v16 = vpop.f32.mrb[30].mxu1 }
 0x205   : > { %v3528_v58 = vpack.c.bf16 %v2996_v53, %v2996_v53  ;;  %v2990_v14 = vadd.f32 %v3516_v40, %v2975_v6  ;;  %v2969_v15 = vmax.f32 %v4306_v21, %v4314_v8  ;;  %v4282_v17 = vpop.f32.mrb[30].mxu0  ;;  %v1718_v57 = vpop.f32.mrb[31].mxu1 }
 0x206   : > { %3038 = vst.msk [vmem:[%s5475_s16 + $0x4] sm:$0xf] %vm3036_vm1, %v3529_v12  ;;  %v2999_v19 = vmax.f32 %v2991_v34, 0.0  ;;  %v2978_v20 = vmax.f32 %v2962_v0, %v2970_v55  ;;  %v4315_v36 = vadd.f32 %v4282_v17, %v4082_v16  ;;  %v2916_v59 = vpop.f32.mrb[31].mxu0 }
 0x207   : > { %3037 = vst.msk [vmem:[%s5475_s16] sm:$0xf] %vm3036_vm1, %v3528_v58  ;;  %v2998_v18 = vmax.f32 %v2990_v14, 0.0  ;;  %v2977_v21 = vmax.f32 %v2961_v2, %v2969_v15  ;;  %v4316_v23 = vadd.f32 %v2916_v59, %v1718_v57 }
 0x208   : > { %v3531_v24 = vpack.c.bf16 %v2999_v19, %v2999_v19  ;;  %v2993_v26 = vadd.f32 %v3516_v40, %v2978_v20  ;;  %v2972_v27 = vmax.f32 %v5461_v25, %v4315_v36 }
 0x209   : > { %v3530_v39 = vpack.c.bf16 %v2998_v18, %v2998_v18  ;;  %v2992_v61 = vadd.f32 %v3516_v40, %v2977_v21  ;;  %v2971_v0 = vmax.f32 %v5463_v28, %v4316_v23 }
 0x20a   : > { %3040 = vst.msk [vmem:[%s5475_s16 + $0xc] sm:$0xf] %vm3036_vm1, %v3531_v24  ;;  %v3001_v29 = vmax.f32 %v2993_v26, 0.0  ;;  %v2980_v41 = vmax.f32 %v2964_v47, %v2972_v27 }
 0x20b   : > { %3039 = vst.msk [vmem:[%s5475_s16 + $0x8] sm:$0xf] %vm3036_vm1, %v3530_v39  ;;  %v3000_v63 = vmax.f32 %v2992_v61, 0.0  ;;  %v2979_v2 = vmax.f32 %v2963_v38, %v2971_v0 }
 0x20c   : > { %v3533_v25 = vpack.c.bf16 %v3001_v29, %v3001_v29  ;;  %v2995_v30 = vadd.f32 %v3516_v40, %v2980_v41 }
 0x20d   : > { %v3532_v31 = vpack.c.bf16 %v3000_v63, %v3000_v63  ;;  %v2994_v28 = vadd.f32 %v3516_v40, %v2979_v2 }
 0x20e   : > { %3042 = vst.msk [vmem:[%s5475_s16 + $0x14] sm:$0xf] %vm3036_vm1, %v3533_v25  ;;  %v3003_v32 = vmax.f32 %v2995_v30, 0.0 }
 0x20f   : > { %3041 = vst.msk [vmem:[%s5475_s16 + $0x10] sm:$0xf] %vm3036_vm1, %v3532_v31  ;;  %v3002_v33 = vmax.f32 %v2994_v28, 0.0 }
 0x210   : > { %v3535_v43 = vpack.c.bf16 %v3003_v32, %v3003_v32 }
 0x211   : > { %v3534_v4 = vpack.c.bf16 %v3002_v33, %v3002_v33 }
 0x212   : > { %3044 = vst.msk [vmem:[%s5475_s16 + $0x1c] sm:$0xf] %vm3036_vm1, %v3535_v43 }
 0x213   : > { %3043 = vst.msk [vmem:[%s5475_s16 + $0x18] sm:$0xf] %vm3036_vm1, %v3534_v4 }
 0x214 PF: > { %s13_s12 = sadd.s32 1, %s4556_s12  }
 0x215   : > { %p10_p4 = scmp.ge.s32.totalorder %s13_s12, 4  }
 0x217   :  { %12 = sbr.rel (!%p10_p4) target bundleno = 1 (0x1), region = 77 }

</bundles_post_ra>
